<compile_context>
chip_gen: v5e
topology: v5e:2x2
jax: 0.10.0
libtpu: 0.0.40
codegen_flags: <defaults>
</compile_context>

<pallas_src>
import jax
import jax.numpy as jnp
from jax import lax
from jax.experimental import pallas as pl
from jax.experimental.pallas import tpu as pltpu


def _ensemble_kernel(x_ref, w_ref, b_ref, o_ref):
    """One output tile: mean over M models of (x @ W_m) + mean_m(b_m).

    x_ref: (B, D)      resident activation
    w_ref: (M, D, tn)  all M models' weights for this N-tile (VMEM resident)
    b_ref: (M, tn)     all M models' biases for this N-tile
    o_ref: (B, tn)     averaged logits for this N-tile
    """
    num_models = w_ref.shape[0]
    x = x_ref[...]

    def body(m, acc):
        # One MXU matmul per client model, f32 accumulation.
        return acc + jnp.dot(x, w_ref[m], preferred_element_type=jnp.float32)

    acc = lax.fori_loop(
        0, num_models, body, jnp.zeros(o_ref.shape, jnp.float32), unroll=True
    )

    inv_m = 1.0 / num_models
    # Average the biases once (instead of adding b_m inside the model loop).
    bias_mean = jnp.sum(b_ref[...], axis=0, keepdims=True) * inv_m  # (1, tn)
    o_ref[...] = (acc * inv_m + bias_mean).astype(o_ref.dtype)


def pred_avg_ensemble(x_nchw, weights, biases, *, tn=128):
    """Forward pass of PredAvgEnsemble.

    x_nchw:  (B, C, H, W) float32
    weights: (M, D, N)    float32, D = C*H*W, one Linear(D, N) weight per client
    biases:  (M, N)       float32
    returns: (B, N)       float32  -- mean over the M client predictions
    """
    B = x_nchw.shape[0]
    M, D, N = weights.shape
    x_flat = x_nchw.reshape(B, D)  # glue: NCHW flatten, plain JAX

    # Pad the class axis to a lane-dense multiple of 128 (unmasked stores,
    # clean N-tiling); slice the padding off after the kernel.
    n_pad = ((N + 127) // 128) * 128
    if n_pad != N:
        weights = jnp.pad(weights, ((0, 0), (0, 0), (0, n_pad - N)))
        biases = jnp.pad(biases, ((0, 0), (0, n_pad - N)))
    tn = min(tn, n_pad)
    assert n_pad % tn == 0 and tn % 128 == 0

    # Per grid step the weight block is M*D*tn*4 bytes (double-buffered); at
    # the example sizes that is 2 MiB, far under every chip's VMEM budget.
    # TODO(synk): for very large D add a K-reduction grid axis (reduction last)
    # and raise vmem_limit_bytes so the weight stream stays at HBM roofline on
    # v7x's 64 MiB VMEM.
    out = pl.pallas_call(
        _ensemble_kernel,
        out_shape=jax.ShapeDtypeStruct((B, n_pad), x_flat.dtype),
        grid_spec=pltpu.PrefetchScalarGridSpec(
            num_scalar_prefetch=0,
            grid=(n_pad // tn,),  # one step per N-tile; M handled in-kernel
            in_specs=[
                pl.BlockSpec((B, D), lambda j: (0, 0)),        # x: resident
                pl.BlockSpec((M, D, tn), lambda j: (0, 0, j)),  # all models' W
                pl.BlockSpec((M, tn), lambda j: (0, j)),        # all models' b
            ],
            out_specs=pl.BlockSpec((B, tn), lambda j: (0, j)),
        ),
        compiler_params=pltpu.CompilerParams(
            # Independent N-tiles: lets Mosaic shard across v7x's 2 TensorCores.
            dimension_semantics=("parallel",),
        ),
    )(x_flat, weights, biases)

    return out[:, :N]


def pred_avg_ensemble_ref(x_nchw, weights, biases):
    """Pure-JAX reference mirroring the PyTorch forward."""
    B = x_nchw.shape[0]
    M, D, N = weights.shape
    x_flat = x_nchw.reshape(B, D)
    preds = jnp.stack(
        [x_flat @ weights[m] + biases[m] for m in range(M)], axis=0
    )  # (M, B, N)
    return jnp.mean(preds, axis=0)


if __name__ == "__main__":
    key = jax.random.PRNGKey(0)
    kx, kw, kb = jax.random.split(key, 3)

    # Small shapes consistent with the module's forward (image classifier input).
    B, C, H, W = 2, 4, 16, 16
    M = 4            # number of client models in the ensemble
    N = 10           # number of classes
    D = C * H * W    # 1024

    x = jax.random.normal(kx, (B, C, H, W), dtype=jnp.float32)
    # Deterministic synthetic per-client parameters (one Linear(D, N) per client).
    weights = 0.02 * jax.random.normal(kw, (M, D, N), dtype=jnp.float32)
    biases = 0.1 * jax.random.normal(kb, (M, N), dtype=jnp.float32)

    out = pred_avg_ensemble(x, weights, biases)
    out = jax.block_until_ready(out)

    ref = pred_avg_ensemble_ref(x, weights, biases)
    assert out.shape == (B, N), out.shape
    assert jnp.allclose(out, ref, atol=1e-4, rtol=1e-4), (
        float(jnp.max(jnp.abs(out - ref)))
    )

    print("KERNEL_OK")
</pallas_src>

<mosaic_0001>
module attributes {stable_mosaic.version = 11 : i64} {
  func.func @_ensemble_kernel(%arg0: i32, %arg1: memref<2x1024xf32, #tpu.memory_space<vmem>>, %arg2: memref<4x1024x128xf32, #tpu.memory_space<vmem>>, %arg3: memref<4x128xf32, #tpu.memory_space<vmem>>, %arg4: memref<2x128xf32, #tpu.memory_space<vmem>>) attributes {dimension_semantics = [#tpu.dimension_semantics<parallel>], iteration_bounds = array<i64: 1>, scalar_prefetch = 0 : i64, scratch_operands = 0 : i64, tpu.core_type = #tpu.core_type<tc>, window_params = [{pipeline_mode = #tpu.pipeline_mode<synchronous>, transform_indices = @transform_0, window_bounds = array<i64: 2, 1024>}, {transform_indices = @transform_1, window_bounds = array<i64: 4, 1024, 128>}, {transform_indices = @transform_2, window_bounds = array<i64: 4, 128>}, {transform_indices = @transform_3, window_bounds = array<i64: 2, 128>}]} {
    %c0 = arith.constant 0 : index
    %c0_0 = arith.constant 0 : index
    %0 = vector.load %arg1[%c0, %c0_0] : memref<2x1024xf32, #tpu.memory_space<vmem>>, vector<2x1024xf32>
    %cst = arith.constant 0.000000e+00 : f32
    %1 = vector.broadcast %cst : f32 to vector<2x128xf32>
    %c0_i32 = arith.constant 0 : i32
    %2 = arith.index_cast %c0_i32 : i32 to index
    %c0_1 = arith.constant 0 : index
    %c0_2 = arith.constant 0 : index
    %3 = vector.load %arg2[%2, %c0_1, %c0_2] : memref<4x1024x128xf32, #tpu.memory_space<vmem>>, vector<1x1024x128xf32>
    %4 = vector.shape_cast %3 : vector<1x1024x128xf32> to vector<1024x128xf32>
    %cst_3 = arith.constant dense<0.000000e+00> : vector<2x128xf32>
    %5 = tpu.matmul %0, %4, %cst_3 {dimension_numbers = #tpu.dot_dimension_numbers<[1], [0], [0], [1], [0, 0, 1, 1], [], []>} : vector<2x1024xf32>, vector<1024x128xf32>, vector<2x128xf32> -> vector<2x128xf32>
    %6 = arith.addf %1, %5 : vector<2x128xf32>
    %c1_i32 = arith.constant 1 : i32
    %7 = arith.index_cast %c1_i32 : i32 to index
    %c0_4 = arith.constant 0 : index
    %c0_5 = arith.constant 0 : index
    %8 = vector.load %arg2[%7, %c0_4, %c0_5] : memref<4x1024x128xf32, #tpu.memory_space<vmem>>, vector<1x1024x128xf32>
    %9 = vector.shape_cast %8 : vector<1x1024x128xf32> to vector<1024x128xf32>
    %cst_6 = arith.constant dense<0.000000e+00> : vector<2x128xf32>
    %10 = tpu.matmul %0, %9, %cst_6 {dimension_numbers = #tpu.dot_dimension_numbers<[1], [0], [0], [1], [0, 0, 1, 1], [], []>} : vector<2x1024xf32>, vector<1024x128xf32>, vector<2x128xf32> -> vector<2x128xf32>
    %11 = arith.addf %6, %10 : vector<2x128xf32>
    %c2_i32 = arith.constant 2 : i32
    %12 = arith.index_cast %c2_i32 : i32 to index
    %c0_7 = arith.constant 0 : index
    %c0_8 = arith.constant 0 : index
    %13 = vector.load %arg2[%12, %c0_7, %c0_8] : memref<4x1024x128xf32, #tpu.memory_space<vmem>>, vector<1x1024x128xf32>
    %14 = vector.shape_cast %13 : vector<1x1024x128xf32> to vector<1024x128xf32>
    %cst_9 = arith.constant dense<0.000000e+00> : vector<2x128xf32>
    %15 = tpu.matmul %0, %14, %cst_9 {dimension_numbers = #tpu.dot_dimension_numbers<[1], [0], [0], [1], [0, 0, 1, 1], [], []>} : vector<2x1024xf32>, vector<1024x128xf32>, vector<2x128xf32> -> vector<2x128xf32>
    %16 = arith.addf %11, %15 : vector<2x128xf32>
    %c3_i32 = arith.constant 3 : i32
    %17 = arith.index_cast %c3_i32 : i32 to index
    %c0_10 = arith.constant 0 : index
    %c0_11 = arith.constant 0 : index
    %18 = vector.load %arg2[%17, %c0_10, %c0_11] : memref<4x1024x128xf32, #tpu.memory_space<vmem>>, vector<1x1024x128xf32>
    %19 = vector.shape_cast %18 : vector<1x1024x128xf32> to vector<1024x128xf32>
    %cst_12 = arith.constant dense<0.000000e+00> : vector<2x128xf32>
    %20 = tpu.matmul %0, %19, %cst_12 {dimension_numbers = #tpu.dot_dimension_numbers<[1], [0], [0], [1], [0, 0, 1, 1], [], []>} : vector<2x1024xf32>, vector<1024x128xf32>, vector<2x128xf32> -> vector<2x128xf32>
    %21 = arith.addf %16, %20 : vector<2x128xf32>
    %c4_i32 = arith.constant 4 : i32
    %c0_13 = arith.constant 0 : index
    %c0_14 = arith.constant 0 : index
    %22 = vector.load %arg3[%c0_13, %c0_14] : memref<4x128xf32, #tpu.memory_space<vmem>>, vector<4x128xf32>
    %cst_15 = arith.constant dense<0.000000e+00> : vector<128xf32>
    %23 = vector.multi_reduction <add>, %22, %cst_15 [0] : vector<4x128xf32> to vector<128xf32>
    %24 = vector.shape_cast %23 : vector<128xf32> to vector<1x128xf32>
    %cst_16 = arith.constant 2.500000e-01 : f32
    %25 = vector.broadcast %cst_16 : f32 to vector<1x128xf32>
    %26 = arith.mulf %24, %25 : vector<1x128xf32>
    %cst_17 = arith.constant 2.500000e-01 : f32
    %27 = vector.broadcast %cst_17 : f32 to vector<2x128xf32>
    %28 = arith.mulf %21, %27 : vector<2x128xf32>
    %29 = vector.broadcast %26 : vector<1x128xf32> to vector<2x128xf32>
    %30 = arith.addf %28, %29 : vector<2x128xf32>
    %c0_18 = arith.constant 0 : index
    %c0_19 = arith.constant 0 : index
    %31 = vector.load %arg4[%c0_18, %c0_19] : memref<2x128xf32, #tpu.memory_space<vmem>>, vector<2x128xf32>
    tpu.vector_store %arg4[%c0_18, %c0_19], %30 {strides = array<i32>} : memref<2x128xf32, #tpu.memory_space<vmem>>, vector<2x128xf32>,
    return
  }
  func.func @transform_0(%arg0: i32) -> (i32, i32) {
    %c0_i32 = arith.constant 0 : i32
    %c0_i32_0 = arith.constant 0 : i32
    %c0_i32_1 = arith.constant 0 : i32
    return %c0_i32, %c0_i32_0 : i32, i32
  }
  func.func @transform_1(%arg0: i32) -> (i32, i32, i32) {
    %c0_i32 = arith.constant 0 : i32
    %c0_i32_0 = arith.constant 0 : i32
    %c0_i32_1 = arith.constant 0 : i32
    return %c0_i32, %c0_i32_0, %arg0 : i32, i32, i32
  }
  func.func @transform_2(%arg0: i32) -> (i32, i32) {
    %c0_i32 = arith.constant 0 : i32
    %c0_i32_0 = arith.constant 0 : i32
    return %c0_i32, %arg0 : i32, i32
  }
  func.func @transform_3(%arg0: i32) -> (i32, i32) {
    %c0_i32 = arith.constant 0 : i32
    %c0_i32_0 = arith.constant 0 : i32
    return %c0_i32, %arg0 : i32, i32
  }
}

</mosaic_0001>

<bundles_post_ra>
// kernel: tpu_custom_call.1
= control target key start
LH: loop header
LB: loop body
LE: loop exit
PB: predicated region body
PF: predicated region fallthrough
CT: control target
= control target key end

     0   :  { %8 = vsyncpa [#allocation3], 0  ;;  %s1553_s0 = inlined_call_operand.hbm [shape: f32[2,1024], index: 0, kind: input, shape index: {}]   ;;  %s1554_s1 = inlined_call_operand.hbm [shape: f32[4,1024,128], index: 1, kind: input, shape index: {}]   ;;  %s1555_s2 = inlined_call_operand.hbm [shape: f32[4,128], index: 2, kind: input, shape index: {}]   ;;  %s1556_s3 = inlined_call_operand.hbm [shape: f32[2,128], index: 3, kind: output, shape index: {}]  }
   0x1   :  { %9 = vsyncpa [#allocation6], 0  ;;  %s26_s14 = sshll.u32 %s1554_s1, 4  ;;  %s27_s14 = int_to_ptr.hbm [resolvable:$true] %s26_s14 }
   0x2   :  { %10 = vsyncpa [#allocation4], 0  ;;  %s1434_s15 = smov [#allocation5]   ;;  %s16_s19 = sshll.u32 %s1553_s0, 4  ;;  %s17_s19 = int_to_ptr.hbm [resolvable:$true] %s16_s19 }
   0x3   :  { %s28_s16 = sshll.u32 %s1434_s15, 4  ;;  %s1435_s20 = smov 128   ;;  %s29_s16 = int_to_ptr.vmem [resolvable:$true] %s28_s16 }
   0x4   :  { %s1436_s21 = smov 8   ;;  %s1437_s22 = smov [#allocation2]  }
   0x5   :  { %34 = dma.hbm_to_vmem [thread:$0]  %s27_s14, 65536, %s29_s16, [#allocation6], %s1435_s20, %s1435_s20, %s1436_s21  }
   0x6   :  { %s18_s23 = sshll.u32 %s1437_s22, 4  ;;  %s40_s26 = sshll.u32 %s1555_s2, 4  ;;  %s19_s23 = int_to_ptr.vmem [resolvable:$true] %s18_s23  ;;  %s41_s26 = int_to_ptr.hbm [resolvable:$true] %s40_s26 }
   0x7   :  { %21 = dma.hbm_to_vmem [thread:$0]  %s17_s19, 256, %s19_s23, [#allocation3]  }
   0x8   :  { %s1438_s1 = smov [#allocation7]  }
   0x9   :  { %s42_s27 = sshll.u32 %s1438_s1, 4  ;;  %s43_s27 = int_to_ptr.vmem [resolvable:$true] %s42_s27 }
   0xa   :  { %45 = dma.hbm_to_vmem [thread:$0]  %s41_s26, 64, %s43_s27, [#allocation6]  }
   0xb   :  { %1428 = dma.done.wait [#allocation3], 256  }
   0xc   :  { %1429 = vsyncadd [#allocation3], 4294967040 }
   0xd   :  { %1430 = dma.done.wait [#allocation6], 65600  }
   0xe   :  { %1431 = vsyncadd [#allocation6], 4294901696  ;;  %v204_v0 = vld [vmem:[#allocation5 + $0x478] sm:$0xff]  ;;  %v203_v2 = vld [vmem:[#allocation5 + $0x470] sm:$0xff]  ;;  %vm1296_vm0 = vcmask 1043456   ;;  %s1439_s0 = smov [#allocation8]  }
   0xf   :  { %v236_v1 = vld [vmem:[#allocation5 + $0x578] sm:$0xff]  ;;  %338 = vmatpush.msra.mxu0 %v204_v0  ;;  %v235_v4 = vld [vmem:[#allocation5 + $0x570] sm:$0xff]  ;;  %v202_v6 = vld [vmem:[#allocation5 + $0x468] sm:$0xff]  ;;  %s1313_s2 = sshll.u32 %s1439_s0, 4  ;;  %s1315_s30 = sshll.u32 %s1556_s3, 4  ;;  %s1314_s2 = int_to_ptr.vmem [resolvable:$true] %s1313_s2  ;;  %s1316_s30 = int_to_ptr.hbm [resolvable:$true] %s1315_s30 }
  0x10   :  { %378 = vmatpush.msra.mxu2 %v236_v1  ;;  %v220_v3 = vld [vmem:[#allocation5 + $0x4f8] sm:$0xff]  ;;  %v219_v7 = vld [vmem:[#allocation5 + $0x4f0] sm:$0xff]  ;;  %v234_v8 = vld [vmem:[#allocation5 + $0x568] sm:$0xff] }
  0x11   :  { %v252_v5 = vld [vmem:[#allocation5 + $0x5f8] sm:$0xff]  ;;  %358 = vmatpush.msra.mxu1 %v220_v3  ;;  %339 = vmatpush.msra.mxu0 %v203_v2  ;;  %v251_v9 = vld [vmem:[#allocation5 + $0x5f0] sm:$0xff]  ;;  %v218_v10 = vld [vmem:[#allocation5 + $0x4e8] sm:$0xff] }
  0x12   :  { %398 = vmatpush.msra.mxu3 %v252_v5  ;;  %379 = vmatpush.msra.mxu2 %v235_v4  ;;  %v201_v11 = vld [vmem:[#allocation5 + $0x460] sm:$0xff]  ;;  %v250_v13 = vld [vmem:[#allocation5 + $0x5e8] sm:$0xff]  ;;  %v200_v16 = vld [vmem:[#allocation5 + $0x458] sm:$0xff] }
  0x13   :  { %359 = vmatpush.msra.mxu1 %v219_v7  ;;  %v233_v12 = vld [vmem:[#allocation5 + $0x560] sm:$0xff]  ;;  %340 = vmatpush.msra.mxu0 %v202_v6  ;;  %v232_v17 = vld [vmem:[#allocation5 + $0x558] sm:$0xff]  ;;  %v199_v20 = vld [vmem:[#allocation5 + $0x450] sm:$0xff] }
  0x14   :  { %399 = vmatpush.msra.mxu3 %v251_v9  ;;  %380 = vmatpush.msra.mxu2 %v234_v8  ;;  %v217_v14 = vld [vmem:[#allocation5 + $0x4e0] sm:$0xff]  ;;  %v216_v18 = vld [vmem:[#allocation5 + $0x4d8] sm:$0xff]  ;;  %v231_v21 = vld [vmem:[#allocation5 + $0x550] sm:$0xff] }
  0x15   :  { %v249_v15 = vld [vmem:[#allocation5 + $0x5e0] sm:$0xff]  ;;  %360 = vmatpush.msra.mxu1 %v218_v10  ;;  %341 = vmatpush.msra.mxu0 %v201_v11  ;;  %v248_v19 = vld [vmem:[#allocation5 + $0x5d8] sm:$0xff]  ;;  %v215_v22 = vld [vmem:[#allocation5 + $0x4d0] sm:$0xff] }
  0x16   :  { %400 = vmatpush.msra.mxu3 %v250_v13  ;;  %381 = vmatpush.msra.mxu2 %v233_v12  ;;  %v247_v23 = vld [vmem:[#allocation5 + $0x5d0] sm:$0xff]  ;;  %v198_v24 = vld [vmem:[#allocation5 + $0x448] sm:$0xff]  ;;  %v197_v28 = vld [vmem:[#allocation5 + $0x440] sm:$0xff] }
  0x17   :  { %361 = vmatpush.msra.mxu1 %v217_v14  ;;  %342 = vmatpush.msra.mxu0 %v200_v16  ;;  %v230_v25 = vld [vmem:[#allocation5 + $0x548] sm:$0xff]  ;;  %v229_v29 = vld [vmem:[#allocation5 + $0x540] sm:$0xff]  ;;  %v196_v32 = vld [vmem:[#allocation5 + $0x438] sm:$0xff] }
  0x18   :  { %401 = vmatpush.msra.mxu3 %v249_v15  ;;  %382 = vmatpush.msra.mxu2 %v232_v17  ;;  %v214_v26 = vld [vmem:[#allocation5 + $0x4c8] sm:$0xff]  ;;  %v213_v30 = vld [vmem:[#allocation5 + $0x4c0] sm:$0xff]  ;;  %v228_v33 = vld [vmem:[#allocation5 + $0x538] sm:$0xff] }
  0x19   :  { %362 = vmatpush.msra.mxu1 %v216_v18  ;;  %343 = vmatpush.msra.mxu0 %v199_v20  ;;  %v246_v27 = vld [vmem:[#allocation5 + $0x5c8] sm:$0xff]  ;;  %v245_v31 = vld [vmem:[#allocation5 + $0x5c0] sm:$0xff]  ;;  %v212_v34 = vld [vmem:[#allocation5 + $0x4b8] sm:$0xff] }
  0x1a   :  { %402 = vmatpush.msra.mxu3 %v248_v19  ;;  %383 = vmatpush.msra.mxu2 %v231_v21  ;;  %v244_v35 = vld [vmem:[#allocation5 + $0x5b8] sm:$0xff]  ;;  %v195_v36 = vld [vmem:[#allocation5 + $0x430] sm:$0xff]  ;;  %v194_v40 = vld [vmem:[#allocation5 + $0x428] sm:$0xff] }
  0x1b   :  { %363 = vmatpush.msra.mxu1 %v215_v22  ;;  %344 = vmatpush.msra.mxu0 %v198_v24  ;;  %v227_v37 = vld [vmem:[#allocation5 + $0x530] sm:$0xff]  ;;  %v226_v41 = vld [vmem:[#allocation5 + $0x528] sm:$0xff]  ;;  %v193_v44 = vld [vmem:[#allocation5 + $0x420] sm:$0xff] }
  0x1c   :  { %403 = vmatpush.msra.mxu3 %v247_v23  ;;  %384 = vmatpush.msra.mxu2 %v230_v25  ;;  %v211_v38 = vld [vmem:[#allocation5 + $0x4b0] sm:$0xff]  ;;  %v210_v42 = vld [vmem:[#allocation5 + $0x4a8] sm:$0xff]  ;;  %v225_v45 = vld [vmem:[#allocation5 + $0x520] sm:$0xff] }
  0x1d   :  { %364 = vmatpush.msra.mxu1 %v214_v26  ;;  %345 = vmatpush.msra.mxu0 %v197_v28  ;;  %v243_v39 = vld [vmem:[#allocation5 + $0x5b0] sm:$0xff]  ;;  %v242_v43 = vld [vmem:[#allocation5 + $0x5a8] sm:$0xff]  ;;  %v209_v46 = vld [vmem:[#allocation5 + $0x4a0] sm:$0xff] }
  0x1e   :  { %404 = vmatpush.msra.mxu3 %v246_v27  ;;  %385 = vmatpush.msra.mxu2 %v229_v29  ;;  %v241_v47 = vld [vmem:[#allocation5 + $0x5a0] sm:$0xff]  ;;  %v192_v48 = vld [vmem:[#allocation5 + $0x418] sm:$0xff]  ;;  %v191_v52 = vld [vmem:[#allocation5 + $0x410] sm:$0xff] }
  0x1f   :  { %365 = vmatpush.msra.mxu1 %v213_v30  ;;  %346 = vmatpush.msra.mxu0 %v196_v32  ;;  %v224_v49 = vld [vmem:[#allocation5 + $0x518] sm:$0xff]  ;;  %v223_v53 = vld [vmem:[#allocation5 + $0x510] sm:$0xff]  ;;  %v190_v56 = vld [vmem:[#allocation5 + $0x408] sm:$0xff] }
  0x20   :  { %405 = vmatpush.msra.mxu3 %v245_v31  ;;  %386 = vmatpush.msra.mxu2 %v228_v33  ;;  %v208_v50 = vld [vmem:[#allocation5 + $0x498] sm:$0xff]  ;;  %v207_v54 = vld [vmem:[#allocation5 + $0x490] sm:$0xff]  ;;  %v222_v57 = vld [vmem:[#allocation5 + $0x508] sm:$0xff] }
  0x21   :  { %366 = vmatpush.msra.mxu1 %v212_v34  ;;  %347 = vmatpush.msra.mxu0 %v195_v36  ;;  %v240_v51 = vld [vmem:[#allocation5 + $0x598] sm:$0xff]  ;;  %v239_v55 = vld [vmem:[#allocation5 + $0x590] sm:$0xff]  ;;  %v206_v58 = vld [vmem:[#allocation5 + $0x488] sm:$0xff] }
  0x22   :  { %406 = vmatpush.msra.mxu3 %v244_v35  ;;  %387 = vmatpush.msra.mxu2 %v227_v37  ;;  %v238_v59 = vld [vmem:[#allocation5 + $0x588] sm:$0xff]  ;;  %v189_v60 = vld [vmem:[#allocation5 + $0x400] sm:$0xff]  ;;  %v268_v62 = vld [vmem:[#allocation5 + $0x678] sm:$0xff] }
  0x23   :  { %367 = vmatpush.msra.mxu1 %v211_v38  ;;  %348 = vmatpush.msra.mxu0 %v194_v40  ;;  %v221_v61 = vld [vmem:[#allocation5 + $0x500] sm:$0xff]  ;;  %v300_v63 = vld [vmem:[#allocation5 + $0x778] sm:$0xff]  ;;  %v267_v2 = vld [vmem:[#allocation5 + $0x670] sm:$0xff] }
  0x24   :  { %407 = vmatpush.msra.mxu3 %v243_v39  ;;  %388 = vmatpush.msra.mxu2 %v226_v41  ;;  %v205_v0 = vld [vmem:[#allocation5 + $0x480] sm:$0xff]  ;;  %v284_v3 = vld [vmem:[#allocation5 + $0x6f8] sm:$0xff]  ;;  %v299_v4 = vld [vmem:[#allocation5 + $0x770] sm:$0xff] }
  0x25   :  { %368 = vmatpush.msra.mxu1 %v210_v42  ;;  %349 = vmatpush.msra.mxu0 %v193_v44  ;;  %v237_v1 = vld [vmem:[#allocation5 + $0x580] sm:$0xff]  ;;  %v316_v5 = vld [vmem:[#allocation5 + $0x7f8] sm:$0xff]  ;;  %v266_v6 = vld [vmem:[#allocation5 + $0x668] sm:$0xff] }
  0x26   :  { %408 = vmatpush.msra.mxu3 %v242_v43  ;;  %389 = vmatpush.msra.mxu2 %v225_v45  ;;  %v283_v7 = vld [vmem:[#allocation5 + $0x6f0] sm:$0xff]  ;;  %v298_v8 = vld [vmem:[#allocation5 + $0x768] sm:$0xff]  ;;  %v265_v10 = vld [vmem:[#allocation5 + $0x660] sm:$0xff] }
  0x27   :  { %369 = vmatpush.msra.mxu1 %v209_v46  ;;  %350 = vmatpush.msra.mxu0 %v192_v48  ;;  %v315_v9 = vld [vmem:[#allocation5 + $0x7f0] sm:$0xff]  ;;  %v282_v11 = vld [vmem:[#allocation5 + $0x6e8] sm:$0xff]  ;;  %v297_v12 = vld [vmem:[#allocation5 + $0x760] sm:$0xff] }
  0x28   :  { %409 = vmatpush.msra.mxu3 %v241_v47  ;;  %390 = vmatpush.msra.mxu2 %v224_v49  ;;  %v314_v13 = vld [vmem:[#allocation5 + $0x7e8] sm:$0xff]  ;;  %v264_v14 = vld [vmem:[#allocation5 + $0x658] sm:$0xff]  ;;  %v281_v15 = vld [vmem:[#allocation5 + $0x6e0] sm:$0xff] }
  0x29   :  { %370 = vmatpush.msra.mxu1 %v208_v50  ;;  %351 = vmatpush.msra.mxu0 %v191_v52  ;;  %v296_v16 = vld [vmem:[#allocation5 + $0x758] sm:$0xff]  ;;  %v313_v17 = vld [vmem:[#allocation5 + $0x7e0] sm:$0xff]  ;;  %v263_v18 = vld [vmem:[#allocation5 + $0x650] sm:$0xff] }
  0x2a   :  { %410 = vmatpush.msra.mxu3 %v240_v51  ;;  %391 = vmatpush.msra.mxu2 %v223_v53  ;;  %v280_v19 = vld [vmem:[#allocation5 + $0x6d8] sm:$0xff]  ;;  %v295_v20 = vld [vmem:[#allocation5 + $0x750] sm:$0xff]  ;;  %v262_v23 = vld [vmem:[#allocation5 + $0x648] sm:$0xff] }
  0x2b   :  { %371 = vmatpush.msra.mxu1 %v207_v54  ;;  %352 = vmatpush.msra.mxu0 %v190_v56  ;;  %v312_v21 = vld [vmem:[#allocation5 + $0x7d8] sm:$0xff]  ;;  %v1469_v22 = vld [vmem:[#allocation2] sm:$0xff]  ;;  %v294_v25 = vld [vmem:[#allocation5 + $0x748] sm:$0xff] }
  0x2c   :  { %411 = vmatpush.msra.mxu3 %v239_v55  ;;  %392 = vmatpush.msra.mxu2 %v222_v57  ;;  %v279_v24 = vld [vmem:[#allocation5 + $0x6d0] sm:$0xff]  ;;  %319 = vst [vmem:[#allocation1] ss:$4 sm:$0xff] %v1469_v22  ;;  %v261_v27 = vld [vmem:[#allocation5 + $0x640] sm:$0xff]  ;;  %v278_v28 = vld [vmem:[#allocation5 + $0x6c8] sm:$0xff] }
  0x2d   :  { %372 = vmatpush.msra.mxu1 %v206_v58  ;;  %353 = vmatpush.msra.mxu0 %v189_v60  ;;  %v311_v26 = vld [vmem:[#allocation5 + $0x7d0] sm:$0xff]  ;;  %v293_v29 = vld [vmem:[#allocation5 + $0x740] sm:$0xff]  ;;  %v310_v30 = vld [vmem:[#allocation5 + $0x7c8] sm:$0xff] }
  0x2e   :  { %412 = vmatpush.msra.mxu3 %v238_v59  ;;  %393 = vmatpush.msra.mxu2 %v221_v61  ;;  %v260_v31 = vld [vmem:[#allocation5 + $0x638] sm:$0xff]  ;;  %v277_v32 = vld [vmem:[#allocation5 + $0x6c0] sm:$0xff]  ;;  %v259_v35 = vld [vmem:[#allocation5 + $0x630] sm:$0xff] }
  0x2f   :  { %418 = vmatpush.msrb.mxu0 %v268_v62  ;;  %373 = vmatpush.msra.mxu1 %v205_v0  ;;  %v292_v33 = vld [vmem:[#allocation5 + $0x738] sm:$0xff]  ;;  %v309_v34 = vld [vmem:[#allocation5 + $0x7c0] sm:$0xff]  ;;  %v291_v37 = vld [vmem:[#allocation5 + $0x730] sm:$0xff] }
  0x30   :  { %458 = vmatpush.msrb.mxu2 %v300_v63  ;;  %413 = vmatpush.msra.mxu3 %v237_v1  ;;  %v276_v36 = vld [vmem:[#allocation5 + $0x6b8] sm:$0xff]  ;;  %v258_v40 = vld [vmem:[#allocation5 + $0x628] sm:$0xff]  ;;  %v275_v41 = vld [vmem:[#allocation5 + $0x6b0] sm:$0xff] }
  0x31   :  { %419 = vmatpush.msrb.mxu0 %v267_v2  ;;  %438 = vmatpush.msrb.mxu1 %v284_v3  ;;  %v1472_v38 = vld [vmem:[#allocation2 + $0x8] sm:$0xff]  ;;  %v290_v46 = vld [vmem:[#allocation5 + $0x728] sm:$0xff]  ;;  %v307_v47 = vld [vmem:[#allocation5 + $0x7b0] sm:$0xff] }
  0x32   :  { %459 = vmatpush.msrb.mxu2 %v299_v4  ;;  %478 = vmatpush.msrb.mxu3 %v316_v5  ;;  %v308_v39 = vld [vmem:[#allocation5 + $0x7b8] sm:$0xff]  ;;  %321 = vst [vmem:[#allocation1 + $0x20] ss:$4 sm:$0xff] %v1472_v38  ;;  %v257_v48 = vld [vmem:[#allocation5 + $0x620] sm:$0xff]  ;;  %v274_v49 = vld [vmem:[#allocation5 + $0x6a8] sm:$0xff] }
  0x33   :  { %420 = vmatpush.msrb.mxu0 %v266_v6  ;;  %439 = vmatpush.msrb.mxu1 %v283_v7  ;;  %v324_v42 = vld.sshfl [vmem:[#allocation1 + $0x10] sm:$0xff pattern:$0x73625140]  ;;  %v1475_v43 = vld.sshfl [vmem:[#allocation1] sm:$0xff pattern:$0x73625140] }
  0x34   :  { %460 = vmatpush.msrb.mxu2 %v298_v8  ;;  %479 = vmatpush.msrb.mxu3 %v315_v9  ;;  %v1477_v44 = vld.sshfl [vmem:[#allocation1 + $0x18] sm:$0xff pattern:$0x73625140]  ;;  %v1479_v45 = vld.sshfl [vmem:[#allocation1 + $0x8] sm:$0xff pattern:$0x73625140] }
  0x35   :  { %421 = vmatpush.msrb.mxu0 %v265_v10  ;;  %440 = vmatpush.msrb.mxu1 %v282_v11  ;;  %498 = vst [vmem:[#allocation1] ss:$4 sm:$0xff] %v1469_v22  ;;  %v289_v50 = vld [vmem:[#allocation5 + $0x720] sm:$0xff]  ;;  %v306_v51 = vld [vmem:[#allocation5 + $0x7a8] sm:$0xff]  ;;  %v256_v52 = vld [vmem:[#allocation5 + $0x618] sm:$0xff] }
  0x36   :  { %461 = vmatpush.msrb.mxu2 %v297_v12  ;;  %480 = vmatpush.msrb.mxu3 %v314_v13  ;;  %v273_v53 = vld [vmem:[#allocation5 + $0x6a0] sm:$0xff]  ;;  %v288_v54 = vld [vmem:[#allocation5 + $0x718] sm:$0xff]  ;;  %v255_v56 = vld [vmem:[#allocation5 + $0x610] sm:$0xff] }
  0x37   :  { %422 = vmatpush.msrb.mxu0 %v264_v14  ;;  %441 = vmatpush.msrb.mxu1 %v281_v15  ;;  %v305_v55 = vld [vmem:[#allocation5 + $0x7a0] sm:$0xff]  ;;  %v272_v57 = vld [vmem:[#allocation5 + $0x698] sm:$0xff]  ;;  %v287_v62 = vld [vmem:[#allocation5 + $0x710] sm:$0xff] }
  0x38   :  { %462 = vmatpush.msrb.mxu2 %v296_v16  ;;  %481 = vmatpush.msrb.mxu3 %v313_v17  ;;  %v304_v63 = vld [vmem:[#allocation5 + $0x798] sm:$0xff]  ;;  %v254_v0 = vld [vmem:[#allocation5 + $0x608] sm:$0xff]  ;;  %v271_v1 = vld [vmem:[#allocation5 + $0x690] sm:$0xff] }
  0x39   :  { %423 = vmatpush.msrb.mxu0 %v263_v18  ;;  %442 = vmatpush.msrb.mxu1 %v280_v19  ;;  %v1482_v58 = vld.sshfl [vmem:[#allocation1 + $0x30] sm:$0xff pattern:$0x73625140]  ;;  %v1484_v59 = vld.sshfl [vmem:[#allocation1 + $0x20] sm:$0xff pattern:$0x73625140] }
  0x3a   :  { %463 = vmatpush.msrb.mxu2 %v295_v20  ;;  %482 = vmatpush.msrb.mxu3 %v312_v21  ;;  %v1486_v60 = vld.sshfl [vmem:[#allocation1 + $0x38] sm:$0xff pattern:$0x73625140]  ;;  %v1488_v61 = vld.sshfl [vmem:[#allocation1 + $0x28] sm:$0xff pattern:$0x73625140] }
  0x3b   :  { %424 = vmatpush.msrb.mxu0 %v262_v23  ;;  %443 = vmatpush.msrb.mxu1 %v279_v24  ;;  %500 = vst [vmem:[#allocation1 + $0x20] ss:$4 sm:$0xff] %v1472_v38  ;;  %v286_v2 = vld [vmem:[#allocation5 + $0x708] sm:$0xff]  ;;  %v303_v3 = vld [vmem:[#allocation5 + $0x790] sm:$0xff]  ;;  %v253_v4 = vld [vmem:[#allocation5 + $0x600] sm:$0xff] }
  0x3c   :  { %464 = vmatpush.msrb.mxu2 %v294_v25  ;;  %483 = vmatpush.msrb.mxu3 %v311_v26  ;;  %v270_v5 = vld [vmem:[#allocation5 + $0x688] sm:$0xff]  ;;  %v285_v6 = vld [vmem:[#allocation5 + $0x700] sm:$0xff]  ;;  %v75_v8 = vld [vmem:[#allocation5 + $0x78] sm:$0xff] }
  0x3d   :  { %425 = vmatpush.msrb.mxu0 %v261_v27  ;;  %444 = vmatpush.msrb.mxu1 %v278_v28  ;;  %v302_v7 = vld [vmem:[#allocation5 + $0x788] sm:$0xff]  ;;  %v107_v9 = vld [vmem:[#allocation5 + $0x178] sm:$0xff]  ;;  %v269_v10 = vld [vmem:[#allocation5 + $0x680] sm:$0xff] }
  0x3e   :  { %465 = vmatpush.msrb.mxu2 %v293_v29  ;;  %484 = vmatpush.msrb.mxu3 %v310_v30  ;;  %v301_v11 = vld [vmem:[#allocation5 + $0x780] sm:$0xff]  ;;  %v74_v12 = vld [vmem:[#allocation5 + $0x70] sm:$0xff]  ;;  %v91_v13 = vld [vmem:[#allocation5 + $0xf8] sm:$0xff] }
  0x3f   :  { %426 = vmatpush.msrb.mxu0 %v260_v31  ;;  %445 = vmatpush.msrb.mxu1 %v277_v32  ;;  %v106_v14 = vld [vmem:[#allocation5 + $0x170] sm:$0xff]  ;;  %v123_v15 = vld [vmem:[#allocation5 + $0x1f8] sm:$0xff]  ;;  %v73_v16 = vld [vmem:[#allocation5 + $0x68] sm:$0xff] }
  0x40   :  { %466 = vmatpush.msrb.mxu2 %v292_v33  ;;  %485 = vmatpush.msrb.mxu3 %v309_v34  ;;  %v90_v17 = vld [vmem:[#allocation5 + $0xf0] sm:$0xff]  ;;  %v105_v18 = vld [vmem:[#allocation5 + $0x168] sm:$0xff]  ;;  %v72_v20 = vld [vmem:[#allocation5 + $0x60] sm:$0xff] }
  0x41   :  { %427 = vmatpush.msrb.mxu0 %v259_v35  ;;  %446 = vmatpush.msrb.mxu1 %v276_v36  ;;  %v122_v19 = vld [vmem:[#allocation5 + $0x1f0] sm:$0xff]  ;;  %v89_v21 = vld [vmem:[#allocation5 + $0xe8] sm:$0xff]  ;;  %v104_v23 = vld [vmem:[#allocation5 + $0x160] sm:$0xff] }
  0x42   :  { %467 = vmatpush.msrb.mxu2 %v291_v37  ;;  %486 = vmatpush.msrb.mxu3 %v308_v39  ;;  %v121_v24 = vld [vmem:[#allocation5 + $0x1e8] sm:$0xff]  ;;  %v1496_v26 = vld.sshfl [vmem:[#allocation1 + $0x10] sm:$0xff pattern:$0x73625140]  ;;  %v88_v30 = vld [vmem:[#allocation5 + $0xe0] sm:$0xff] }
  0x43   :  { %428 = vmatpush.msrb.mxu0 %v258_v40  ;;  %447 = vmatpush.msrb.mxu1 %v275_v41  ;;  %v1494_v25 = vld.sshfl [vmem:[#allocation1] sm:$0xff pattern:$0x73625140]  ;;  %v1498_v27 = vld.sshfl [vmem:[#allocation1 + $0x8] sm:$0xff pattern:$0x73625140] }
  0x44   :  { %468 = vmatpush.msrb.mxu2 %v290_v46  ;;  %487 = vmatpush.msrb.mxu3 %v307_v47  ;;  %v1500_v28 = vld.sshfl [vmem:[#allocation1 + $0x18] sm:$0xff pattern:$0x73625140]  ;;  %v71_v29 = vld [vmem:[#allocation5 + $0x58] sm:$0xff]  ;;  %v70_v33 = vld [vmem:[#allocation5 + $0x50] sm:$0xff] }
  0x45   :  { %429 = vmatpush.msrb.mxu0 %v257_v48  ;;  %448 = vmatpush.msrb.mxu1 %v274_v49  ;;  %806 = vst [vmem:[#allocation1] ss:$4 sm:$0xff] %v1469_v22  ;;  %v103_v31 = vld [vmem:[#allocation5 + $0x158] sm:$0xff]  ;;  %v120_v32 = vld [vmem:[#allocation5 + $0x1e0] sm:$0xff]  ;;  %v102_v35 = vld [vmem:[#allocation5 + $0x150] sm:$0xff] }
  0x46   :  { %469 = vmatpush.msrb.mxu2 %v289_v50  ;;  %488 = vmatpush.msrb.mxu3 %v306_v51  ;;  %v87_v34 = vld [vmem:[#allocation5 + $0xd8] sm:$0xff]  ;;  %v69_v37 = vld [vmem:[#allocation5 + $0x48] sm:$0xff]  ;;  %v86_v39 = vld [vmem:[#allocation5 + $0xd0] sm:$0xff] }
  0x47   :  { %430 = vmatpush.msrb.mxu0 %v256_v52  ;;  %449 = vmatpush.msrb.mxu1 %v273_v53  ;;  %v119_v36 = vld [vmem:[#allocation5 + $0x1d8] sm:$0xff]  ;;  %v101_v40 = vld [vmem:[#allocation5 + $0x148] sm:$0xff]  ;;  %v118_v41 = vld [vmem:[#allocation5 + $0x1d0] sm:$0xff] }
  0x48   :  { %470 = vmatpush.msrb.mxu2 %v288_v54  ;;  %489 = vmatpush.msrb.mxu3 %v305_v55  ;;  %v67_v46 = vld [vmem:[#allocation5 + $0x38] sm:$0xff]  ;;  %v84_v47 = vld [vmem:[#allocation5 + $0xc0] sm:$0xff]  ;;  %v66_v50 = vld [vmem:[#allocation5 + $0x30] sm:$0xff] }
  0x49   :  { %431 = vmatpush.msrb.mxu0 %v255_v56  ;;  %450 = vmatpush.msrb.mxu1 %v272_v57  ;;  %v99_v48 = vld [vmem:[#allocation5 + $0x138] sm:$0xff]  ;;  %v116_v49 = vld [vmem:[#allocation5 + $0x1c0] sm:$0xff]  ;;  %v98_v52 = vld [vmem:[#allocation5 + $0x130] sm:$0xff] }
  0x4a   :  { %471 = vmatpush.msrb.mxu2 %v287_v62  ;;  %490 = vmatpush.msrb.mxu3 %v304_v63  ;;  %v83_v51 = vld [vmem:[#allocation5 + $0xb8] sm:$0xff]  ;;  %v65_v54 = vld [vmem:[#allocation5 + $0x28] sm:$0xff]  ;;  %v82_v55 = vld [vmem:[#allocation5 + $0xb0] sm:$0xff] }
  0x4b   :  { %432 = vmatpush.msrb.mxu0 %v254_v0  ;;  %451 = vmatpush.msrb.mxu1 %v271_v1  ;;  %v115_v53 = vld [vmem:[#allocation5 + $0x1b8] sm:$0xff]  ;;  %v97_v56 = vld [vmem:[#allocation5 + $0x128] sm:$0xff]  ;;  %v114_v57 = vld [vmem:[#allocation5 + $0x1b0] sm:$0xff] }
  0x4c   :  { %472 = vmatpush.msrb.mxu2 %v286_v2  ;;  %491 = vmatpush.msrb.mxu3 %v303_v3  ;;  %v63_v62 = vld [vmem:[#allocation5 + $0x18] sm:$0xff]  ;;  %v80_v63 = vld [vmem:[#allocation5 + $0xa0] sm:$0xff]  ;;  %v62_v2 = vld [vmem:[#allocation5 + $0x10] sm:$0xff] }
  0x4d   :  { %394 = vmatmul.f32.vlgmr.msra.gmra.mxu2 %v324_v42  ;;  %433 = vmatpush.msrb.mxu0 %v253_v4  ;;  %v68_v42 = vld [vmem:[#allocation5 + $0x40] sm:$0xff]  ;;  %v95_v0 = vld [vmem:[#allocation5 + $0x118] sm:$0xff]  ;;  %v94_v4 = vld [vmem:[#allocation5 + $0x110] sm:$0xff] }
  0x4e   :  { %452 = vmatpush.msrb.mxu1 %v270_v5  ;;  %473 = vmatpush.msrb.mxu2 %v285_v6  ;;  %v112_v1 = vld [vmem:[#allocation5 + $0x1a0] sm:$0xff]  ;;  %v79_v3 = vld [vmem:[#allocation5 + $0x98] sm:$0xff]  ;;  %v61_v6 = vld [vmem:[#allocation5 + $0x8] sm:$0xff] }
  0x4f   :  { %492 = vmatpush.msrb.mxu3 %v302_v7  ;;  %354 = vmatmul.f32.vlgmr.msra.gmra.mxu0 %v1475_v43  ;;  %v85_v43 = vld [vmem:[#allocation5 + $0xc8] sm:$0xff]  ;;  %v111_v5 = vld [vmem:[#allocation5 + $0x198] sm:$0xff]  ;;  %v78_v7 = vld [vmem:[#allocation5 + $0x90] sm:$0xff] }
  0x50   :  { %414 = vmatmul.f32.vlgmr.msra.gmra.mxu3 %v1477_v44  ;;  %517 = vmatpush.msra.mxu0 %v75_v8  ;;  %v100_v44 = vld [vmem:[#allocation5 + $0x140] sm:$0xff]  ;;  %v93_v8 = vld [vmem:[#allocation5 + $0x108] sm:$0xff] }
  0x51   :  { %557 = vmatpush.msra.mxu2 %v107_v9  ;;  %453 = vmatpush.msrb.mxu1 %v269_v10  ;;  %v110_v9 = vld [vmem:[#allocation5 + $0x190] sm:$0xff]  ;;  %v60_v10 = vld [vmem:[#allocation5] sm:$0xff] }
  0x52   :  { %493 = vmatpush.msrb.mxu3 %v301_v11  ;;  %374 = vmatmul.f32.vlgmr.msra.gmra.mxu1 %v1479_v45  ;;  %v117_v45 = vld [vmem:[#allocation5 + $0x1c8] sm:$0xff] }
  0x53   :  { %518 = vmatpush.msra.mxu0 %v74_v12  ;;  %537 = vmatpush.msra.mxu1 %v91_v13  ;;  %v77_v11 = vld [vmem:[#allocation5 + $0x88] sm:$0xff]  ;;  %v92_v12 = vld [vmem:[#allocation5 + $0x100] sm:$0xff] }
  0x54   :  { %558 = vmatpush.msra.mxu2 %v106_v14  ;;  %577 = vmatpush.msra.mxu3 %v123_v15  ;;  %v109_v13 = vld [vmem:[#allocation5 + $0x188] sm:$0xff]  ;;  %v139_v14 = vld [vmem:[#allocation5 + $0x278] sm:$0xff] }
  0x55   :  { %519 = vmatpush.msra.mxu0 %v73_v16  ;;  %538 = vmatpush.msra.mxu1 %v90_v17  ;;  %v171_v15 = vld [vmem:[#allocation5 + $0x378] sm:$0xff]  ;;  %v76_v16 = vld [vmem:[#allocation5 + $0x80] sm:$0xff] }
  0x56   :  { %559 = vmatpush.msra.mxu2 %v105_v18  ;;  %578 = vmatpush.msra.mxu3 %v122_v19  ;;  %v108_v17 = vld [vmem:[#allocation5 + $0x180] sm:$0xff]  ;;  %v138_v18 = vld [vmem:[#allocation5 + $0x270] sm:$0xff]  ;;  %v155_v19 = vld [vmem:[#allocation5 + $0x2f8] sm:$0xff] }
  0x57   :  { %474 = vmatmul.f32.vlgmr.msrb.gmra.mxu2 %v1482_v58  ;;  %520 = vmatpush.msra.mxu0 %v72_v20  ;;  %v64_v58 = vld [vmem:[#allocation5 + $0x20] sm:$0xff]  ;;  %v170_v20 = vld [vmem:[#allocation5 + $0x370] sm:$0xff] }
  0x58   :  { %539 = vmatpush.msra.mxu1 %v89_v21  ;;  %560 = vmatpush.msra.mxu2 %v104_v23  ;;  %v187_v21 = vld [vmem:[#allocation5 + $0x3f8] sm:$0xff]  ;;  %v137_v23 = vld [vmem:[#allocation5 + $0x268] sm:$0xff] }
  0x59   :  { %579 = vmatpush.msra.mxu3 %v121_v24  ;;  %434 = vmatmul.f32.vlgmr.msrb.gmra.mxu0 %v1484_v59  ;;  %v81_v59 = vld [vmem:[#allocation5 + $0xa8] sm:$0xff]  ;;  %v154_v24 = vld [vmem:[#allocation5 + $0x2f0] sm:$0xff] }
  0x5a   :  { %494 = vmatmul.f32.vlgmr.msrb.gmra.mxu3 %v1486_v60  ;;  %521 = vmatpush.msra.mxu0 %v71_v29  ;;  %v96_v60 = vld [vmem:[#allocation5 + $0x120] sm:$0xff]  ;;  %v169_v29 = vld [vmem:[#allocation5 + $0x368] sm:$0xff] }
  0x5b   :  { %540 = vmatpush.msra.mxu1 %v88_v30  ;;  %561 = vmatpush.msra.mxu2 %v103_v31  ;;  %v186_v30 = vld [vmem:[#allocation5 + $0x3f0] sm:$0xff]  ;;  %v1511_v31 = vld.sshfl [vmem:[#allocation1 + $0x20] sm:$0xff pattern:$0x73625140] }
  0x5c   :  { %580 = vmatpush.msra.mxu3 %v120_v32  ;;  %454 = vmatmul.f32.vlgmr.msrb.gmra.mxu1 %v1488_v61  ;;  %v113_v61 = vld [vmem:[#allocation5 + $0x1a8] sm:$0xff]  ;;  %v1517_v32 = vld.sshfl [vmem:[#allocation1 + $0x38] sm:$0xff pattern:$0x73625140] }
  0x5d   :  { %522 = vmatpush.msra.mxu0 %v70_v33  ;;  %541 = vmatpush.msra.mxu1 %v87_v34  ;;  %v136_v33 = vld [vmem:[#allocation5 + $0x260] sm:$0xff]  ;;  %v153_v34 = vld [vmem:[#allocation5 + $0x2e8] sm:$0xff] }
  0x5e   :  { %562 = vmatpush.msra.mxu2 %v102_v35  ;;  %581 = vmatpush.msra.mxu3 %v119_v36  ;;  %v135_v35 = vld [vmem:[#allocation5 + $0x258] sm:$0xff]  ;;  %v152_v36 = vld [vmem:[#allocation5 + $0x2e0] sm:$0xff] }
  0x5f   :  { %523 = vmatpush.msra.mxu0 %v69_v37  ;;  %542 = vmatpush.msra.mxu1 %v86_v39  ;;  %v167_v37 = vld [vmem:[#allocation5 + $0x358] sm:$0xff]  ;;  %v184_v39 = vld [vmem:[#allocation5 + $0x3e0] sm:$0xff] }
  0x60   :  { %563 = vmatpush.msra.mxu2 %v101_v40  ;;  %582 = vmatpush.msra.mxu3 %v118_v41  ;;  %v134_v40 = vld [vmem:[#allocation5 + $0x250] sm:$0xff]  ;;  %v151_v41 = vld [vmem:[#allocation5 + $0x2d8] sm:$0xff] }
  0x61   :  { %524 = vmatpush.msra.mxu0 %v68_v42  ;;  %543 = vmatpush.msra.mxu1 %v85_v43  ;;  %v166_v42 = vld [vmem:[#allocation5 + $0x350] sm:$0xff]  ;;  %v183_v43 = vld [vmem:[#allocation5 + $0x3d8] sm:$0xff] }
  0x62   :  { %564 = vmatpush.msra.mxu2 %v100_v44  ;;  %583 = vmatpush.msra.mxu3 %v117_v45  ;;  %v133_v44 = vld [vmem:[#allocation5 + $0x248] sm:$0xff]  ;;  %v150_v45 = vld [vmem:[#allocation5 + $0x2d0] sm:$0xff] }
  0x63   :  { %525 = vmatpush.msra.mxu0 %v67_v46  ;;  %544 = vmatpush.msra.mxu1 %v84_v47  ;;  %v165_v46 = vld [vmem:[#allocation5 + $0x348] sm:$0xff]  ;;  %v182_v47 = vld [vmem:[#allocation5 + $0x3d0] sm:$0xff] }
  0x64   :  { %565 = vmatpush.msra.mxu2 %v99_v48  ;;  %584 = vmatpush.msra.mxu3 %v116_v49  ;;  %v132_v48 = vld [vmem:[#allocation5 + $0x240] sm:$0xff]  ;;  %v149_v49 = vld [vmem:[#allocation5 + $0x2c8] sm:$0xff] }
  0x65   :  { %526 = vmatpush.msra.mxu0 %v66_v50  ;;  %545 = vmatpush.msra.mxu1 %v83_v51  ;;  %v164_v50 = vld [vmem:[#allocation5 + $0x340] sm:$0xff]  ;;  %v181_v51 = vld [vmem:[#allocation5 + $0x3c8] sm:$0xff] }
  0x66   :  { %566 = vmatpush.msra.mxu2 %v98_v52  ;;  %585 = vmatpush.msra.mxu3 %v115_v53  ;;  %v131_v52 = vld [vmem:[#allocation5 + $0x238] sm:$0xff]  ;;  %v148_v53 = vld [vmem:[#allocation5 + $0x2c0] sm:$0xff] }
  0x67   :  { %527 = vmatpush.msra.mxu0 %v65_v54  ;;  %546 = vmatpush.msra.mxu1 %v82_v55  ;;  %v163_v54 = vld [vmem:[#allocation5 + $0x338] sm:$0xff]  ;;  %v180_v55 = vld [vmem:[#allocation5 + $0x3c0] sm:$0xff] }
  0x68   :  { %567 = vmatpush.msra.mxu2 %v97_v56  ;;  %586 = vmatpush.msra.mxu3 %v114_v57  ;;  %v130_v56 = vld [vmem:[#allocation5 + $0x230] sm:$0xff]  ;;  %v147_v57 = vld [vmem:[#allocation5 + $0x2b8] sm:$0xff] }
  0x69   :  { %528 = vmatpush.msra.mxu0 %v64_v58  ;;  %547 = vmatpush.msra.mxu1 %v81_v59  ;;  %v162_v58 = vld [vmem:[#allocation5 + $0x330] sm:$0xff]  ;;  %v179_v59 = vld [vmem:[#allocation5 + $0x3b8] sm:$0xff] }
  0x6a   :  { %568 = vmatpush.msra.mxu2 %v96_v60  ;;  %587 = vmatpush.msra.mxu3 %v113_v61  ;;  %v129_v60 = vld [vmem:[#allocation5 + $0x228] sm:$0xff]  ;;  %v146_v61 = vld [vmem:[#allocation5 + $0x2b0] sm:$0xff] }
  0x6b   :  { %529 = vmatpush.msra.mxu0 %v63_v62  ;;  %548 = vmatpush.msra.mxu1 %v80_v63  ;;  %v161_v62 = vld [vmem:[#allocation5 + $0x328] sm:$0xff]  ;;  %v178_v63 = vld [vmem:[#allocation5 + $0x3b0] sm:$0xff] }
  0x6c   :  { %569 = vmatpush.msra.mxu2 %v95_v0  ;;  %588 = vmatpush.msra.mxu3 %v112_v1  ;;  %v128_v0 = vld [vmem:[#allocation5 + $0x220] sm:$0xff]  ;;  %v145_v1 = vld [vmem:[#allocation5 + $0x2a8] sm:$0xff] }
  0x6d   :  { %530 = vmatpush.msra.mxu0 %v62_v2  ;;  %549 = vmatpush.msra.mxu1 %v79_v3  ;;  %v160_v2 = vld [vmem:[#allocation5 + $0x320] sm:$0xff]  ;;  %v177_v3 = vld [vmem:[#allocation5 + $0x3a8] sm:$0xff] }
  0x6e   :  { %570 = vmatpush.msra.mxu2 %v94_v4  ;;  %589 = vmatpush.msra.mxu3 %v111_v5  ;;  %v127_v4 = vld [vmem:[#allocation5 + $0x218] sm:$0xff]  ;;  %v144_v5 = vld [vmem:[#allocation5 + $0x2a0] sm:$0xff] }
  0x6f   :  { %531 = vmatpush.msra.mxu0 %v61_v6  ;;  %550 = vmatpush.msra.mxu1 %v78_v7  ;;  %v159_v6 = vld [vmem:[#allocation5 + $0x318] sm:$0xff]  ;;  %v176_v7 = vld [vmem:[#allocation5 + $0x3a0] sm:$0xff] }
  0x70   :  { %571 = vmatpush.msra.mxu2 %v93_v8  ;;  %590 = vmatpush.msra.mxu3 %v110_v9  ;;  %v126_v8 = vld [vmem:[#allocation5 + $0x210] sm:$0xff]  ;;  %v143_v9 = vld [vmem:[#allocation5 + $0x298] sm:$0xff] }
  0x71   :  { %532 = vmatpush.msra.mxu0 %v60_v10  ;;  %551 = vmatpush.msra.mxu1 %v77_v11  ;;  %v158_v10 = vld [vmem:[#allocation5 + $0x310] sm:$0xff]  ;;  %v175_v11 = vld [vmem:[#allocation5 + $0x398] sm:$0xff] }
  0x72   :  { %572 = vmatpush.msra.mxu2 %v92_v12  ;;  %591 = vmatpush.msra.mxu3 %v109_v13  ;;  %v125_v12 = vld [vmem:[#allocation5 + $0x208] sm:$0xff]  ;;  %v142_v13 = vld [vmem:[#allocation5 + $0x290] sm:$0xff] }
  0x73   :  { %533 = vmatmul.f32.vlgmr.msra.gmra.mxu0 %v1494_v25  ;;  %573 = vmatmul.f32.vlgmr.msra.gmra.mxu2 %v1496_v26  ;;  %v1513_v25 = vld.sshfl [vmem:[#allocation1 + $0x30] sm:$0xff pattern:$0x73625140]  ;;  %v1515_v26 = vld.sshfl [vmem:[#allocation1 + $0x28] sm:$0xff pattern:$0x73625140] }
  0x74   :  { %597 = vmatpush.msrb.mxu0 %v139_v14  ;;  %637 = vmatpush.msrb.mxu2 %v171_v15  ;;  %808 = vst [vmem:[#allocation1 + $0x20] ss:$4 sm:$0xff] %v1472_v38  ;;  %v157_v14 = vld [vmem:[#allocation5 + $0x308] sm:$0xff]  ;;  %v174_v15 = vld [vmem:[#allocation5 + $0x390] sm:$0xff] }
  0x75   :  { %552 = vmatpush.msra.mxu1 %v76_v16  ;;  %592 = vmatpush.msra.mxu3 %v108_v17  ;;  %v124_v16 = vld [vmem:[#allocation5 + $0x200] sm:$0xff]  ;;  %v141_v17 = vld [vmem:[#allocation5 + $0x288] sm:$0xff] }
  0x76   :  { %553 = vmatmul.f32.vlgmr.msra.gmra.mxu1 %v1498_v27  ;;  %593 = vmatmul.f32.vlgmr.msra.gmra.mxu3 %v1500_v28  ;;  %v168_v27 = vld [vmem:[#allocation5 + $0x360] sm:$0xff]  ;;  %v185_v28 = vld [vmem:[#allocation5 + $0x3e8] sm:$0xff] }
  0x77   :  { %598 = vmatpush.msrb.mxu0 %v138_v18  ;;  %617 = vmatpush.msrb.mxu1 %v155_v19  ;;  %v156_v18 = vld [vmem:[#allocation5 + $0x300] sm:$0xff]  ;;  %v173_v19 = vld [vmem:[#allocation5 + $0x388] sm:$0xff] }
  0x78   :  { %638 = vmatpush.msrb.mxu2 %v170_v20  ;;  %657 = vmatpush.msrb.mxu3 %v187_v21  ;;  %v693_v20 = vld [vmem:[#allocation5 + $0x878] sm:$0xff] }
  0x79   :  { %599 = vmatpush.msrb.mxu0 %v137_v23  ;;  %618 = vmatpush.msrb.mxu1 %v154_v24  ;;  %v725_v21 = vld [vmem:[#allocation5 + $0x978] sm:$0xff]  ;;  %v140_v23 = vld [vmem:[#allocation5 + $0x280] sm:$0xff] }
  0x7a   :  { %639 = vmatpush.msrb.mxu2 %v169_v29  ;;  %658 = vmatpush.msrb.mxu3 %v186_v30  ;;  %v172_v24 = vld [vmem:[#allocation5 + $0x380] sm:$0xff]  ;;  %v692_v29 = vld [vmem:[#allocation5 + $0x870] sm:$0xff]  ;;  %v709_v30 = vld [vmem:[#allocation5 + $0x8f8] sm:$0xff] }
  0x7b   :  { %600 = vmatpush.msrb.mxu0 %v136_v33  ;;  %619 = vmatpush.msrb.mxu1 %v153_v34  ;;  %v724_v33 = vld [vmem:[#allocation5 + $0x970] sm:$0xff]  ;;  %v741_v34 = vld [vmem:[#allocation5 + $0x9f8] sm:$0xff] }
  0x7c   :  { %640 = vmatpush.msrb.mxu2 %v168_v27  ;;  %659 = vmatpush.msrb.mxu3 %v185_v28  ;;  %v691_v27 = vld [vmem:[#allocation5 + $0x868] sm:$0xff]  ;;  %v708_v28 = vld [vmem:[#allocation5 + $0x8f0] sm:$0xff] }
  0x7d   :  { %601 = vmatpush.msrb.mxu0 %v135_v35  ;;  %620 = vmatpush.msrb.mxu1 %v152_v36  ;;  %v723_v35 = vld [vmem:[#allocation5 + $0x968] sm:$0xff] }
  0x7e   :  { %641 = vmatpush.msrb.mxu2 %v167_v37  ;;  %660 = vmatpush.msrb.mxu3 %v184_v39  ;;  %v707_v36 = vld [vmem:[#allocation5 + $0x8e8] sm:$0xff]  ;;  %v722_v37 = vld [vmem:[#allocation5 + $0x960] sm:$0xff] }
  0x7f   :  { %602 = vmatpush.msrb.mxu0 %v134_v40  ;;  %621 = vmatpush.msrb.mxu1 %v151_v41  ;;  %v739_v39 = vld [vmem:[#allocation5 + $0x9e8] sm:$0xff]  ;;  %v689_v40 = vld [vmem:[#allocation5 + $0x858] sm:$0xff]  ;;  %v738_v41 = vld [vmem:[#allocation5 + $0x9e0] sm:$0xff] }
  0x80   :  { %642 = vmatpush.msrb.mxu2 %v166_v42  ;;  %661 = vmatpush.msrb.mxu3 %v183_v43  ;;  %v688_v42 = vld [vmem:[#allocation5 + $0x850] sm:$0xff]  ;;  %v705_v43 = vld [vmem:[#allocation5 + $0x8d8] sm:$0xff] }
  0x81   :  { %603 = vmatpush.msrb.mxu0 %v133_v44  ;;  %622 = vmatpush.msrb.mxu1 %v150_v45  ;;  %v720_v44 = vld [vmem:[#allocation5 + $0x950] sm:$0xff]  ;;  %v737_v45 = vld [vmem:[#allocation5 + $0x9d8] sm:$0xff] }
  0x82   :  { %643 = vmatpush.msrb.mxu2 %v165_v46  ;;  %662 = vmatpush.msrb.mxu3 %v182_v47  ;;  %v687_v46 = vld [vmem:[#allocation5 + $0x848] sm:$0xff]  ;;  %v704_v47 = vld [vmem:[#allocation5 + $0x8d0] sm:$0xff] }
  0x83   :  { %604 = vmatpush.msrb.mxu0 %v132_v48  ;;  %623 = vmatpush.msrb.mxu1 %v149_v49  ;;  %v719_v48 = vld [vmem:[#allocation5 + $0x948] sm:$0xff]  ;;  %v736_v49 = vld [vmem:[#allocation5 + $0x9d0] sm:$0xff] }
  0x84   :  { %644 = vmatpush.msrb.mxu2 %v164_v50  ;;  %663 = vmatpush.msrb.mxu3 %v181_v51  ;;  %v686_v50 = vld [vmem:[#allocation5 + $0x840] sm:$0xff]  ;;  %v703_v51 = vld [vmem:[#allocation5 + $0x8c8] sm:$0xff] }
  0x85   :  { %605 = vmatpush.msrb.mxu0 %v131_v52  ;;  %624 = vmatpush.msrb.mxu1 %v148_v53  ;;  %v718_v52 = vld [vmem:[#allocation5 + $0x940] sm:$0xff]  ;;  %v735_v53 = vld [vmem:[#allocation5 + $0x9c8] sm:$0xff] }
  0x86   :  { %645 = vmatpush.msrb.mxu2 %v163_v54  ;;  %664 = vmatpush.msrb.mxu3 %v180_v55  ;;  %v685_v54 = vld [vmem:[#allocation5 + $0x838] sm:$0xff]  ;;  %v702_v55 = vld [vmem:[#allocation5 + $0x8c0] sm:$0xff] }
  0x87   :  { %606 = vmatpush.msrb.mxu0 %v130_v56  ;;  %625 = vmatpush.msrb.mxu1 %v147_v57  ;;  %v717_v56 = vld [vmem:[#allocation5 + $0x938] sm:$0xff]  ;;  %v734_v57 = vld [vmem:[#allocation5 + $0x9c0] sm:$0xff] }
  0x88   :  { %646 = vmatpush.msrb.mxu2 %v162_v58  ;;  %665 = vmatpush.msrb.mxu3 %v179_v59  ;;  %v684_v58 = vld [vmem:[#allocation5 + $0x830] sm:$0xff]  ;;  %v701_v59 = vld [vmem:[#allocation5 + $0x8b8] sm:$0xff] }
  0x89   :  { %607 = vmatpush.msrb.mxu0 %v129_v60  ;;  %626 = vmatpush.msrb.mxu1 %v146_v61  ;;  %v716_v60 = vld [vmem:[#allocation5 + $0x930] sm:$0xff]  ;;  %v733_v61 = vld [vmem:[#allocation5 + $0x9b8] sm:$0xff] }
  0x8a   :  { %647 = vmatpush.msrb.mxu2 %v161_v62  ;;  %666 = vmatpush.msrb.mxu3 %v178_v63  ;;  %v683_v62 = vld [vmem:[#allocation5 + $0x828] sm:$0xff]  ;;  %v700_v63 = vld [vmem:[#allocation5 + $0x8b0] sm:$0xff] }
  0x8b   :  { %608 = vmatpush.msrb.mxu0 %v128_v0  ;;  %627 = vmatpush.msrb.mxu1 %v145_v1  ;;  %v715_v0 = vld [vmem:[#allocation5 + $0x928] sm:$0xff]  ;;  %v732_v1 = vld [vmem:[#allocation5 + $0x9b0] sm:$0xff] }
  0x8c   :  { %648 = vmatpush.msrb.mxu2 %v160_v2  ;;  %667 = vmatpush.msrb.mxu3 %v177_v3  ;;  %v682_v2 = vld [vmem:[#allocation5 + $0x820] sm:$0xff]  ;;  %v699_v3 = vld [vmem:[#allocation5 + $0x8a8] sm:$0xff] }
  0x8d   :  { %609 = vmatpush.msrb.mxu0 %v127_v4  ;;  %628 = vmatpush.msrb.mxu1 %v144_v5  ;;  %v714_v4 = vld [vmem:[#allocation5 + $0x920] sm:$0xff]  ;;  %v731_v5 = vld [vmem:[#allocation5 + $0x9a8] sm:$0xff] }
  0x8e   :  { %649 = vmatpush.msrb.mxu2 %v159_v6  ;;  %668 = vmatpush.msrb.mxu3 %v176_v7  ;;  %v681_v6 = vld [vmem:[#allocation5 + $0x818] sm:$0xff]  ;;  %v698_v7 = vld [vmem:[#allocation5 + $0x8a0] sm:$0xff] }
  0x8f   :  { %610 = vmatpush.msrb.mxu0 %v126_v8  ;;  %629 = vmatpush.msrb.mxu1 %v143_v9  ;;  %v713_v8 = vld [vmem:[#allocation5 + $0x918] sm:$0xff]  ;;  %v730_v9 = vld [vmem:[#allocation5 + $0x9a0] sm:$0xff] }
  0x90   :  { %650 = vmatpush.msrb.mxu2 %v158_v10  ;;  %669 = vmatpush.msrb.mxu3 %v175_v11  ;;  %v680_v10 = vld [vmem:[#allocation5 + $0x810] sm:$0xff]  ;;  %v697_v11 = vld [vmem:[#allocation5 + $0x898] sm:$0xff] }
  0x91   :  { %611 = vmatpush.msrb.mxu0 %v125_v12  ;;  %630 = vmatpush.msrb.mxu1 %v142_v13  ;;  %v712_v12 = vld [vmem:[#allocation5 + $0x910] sm:$0xff]  ;;  %v729_v13 = vld [vmem:[#allocation5 + $0x998] sm:$0xff] }
  0x92   :  { %651 = vmatpush.msrb.mxu2 %v157_v14  ;;  %670 = vmatpush.msrb.mxu3 %v174_v15  ;;  %v679_v14 = vld [vmem:[#allocation5 + $0x808] sm:$0xff]  ;;  %v696_v15 = vld [vmem:[#allocation5 + $0x890] sm:$0xff] }
  0x93   :  { %612 = vmatpush.msrb.mxu0 %v124_v16  ;;  %631 = vmatpush.msrb.mxu1 %v141_v17  ;;  %v711_v16 = vld [vmem:[#allocation5 + $0x908] sm:$0xff]  ;;  %v728_v17 = vld [vmem:[#allocation5 + $0x990] sm:$0xff] }
  0x94   :  { %652 = vmatpush.msrb.mxu2 %v156_v18  ;;  %671 = vmatpush.msrb.mxu3 %v173_v19  ;;  %v678_v18 = vld [vmem:[#allocation5 + $0x800] sm:$0xff]  ;;  %v695_v19 = vld [vmem:[#allocation5 + $0x888] sm:$0xff] }
  0x95   :  { %613 = vmatmul.f32.vlgmr.msrb.gmra.mxu0 %v1511_v31  ;;  %653 = vmatmul.f32.vlgmr.msrb.gmra.mxu2 %v1513_v25  ;;  %v740_v31 = vld [vmem:[#allocation5 + $0x9f0] sm:$0xff]  ;;  %v690_v25 = vld [vmem:[#allocation5 + $0x860] sm:$0xff] }
  0x96   :  { %825 = vmatpush.msra.mxu0 %v693_v20  ;;  %865 = vmatpush.msra.mxu2 %v725_v21  ;;  %v710_v20 = vld [vmem:[#allocation5 + $0x900] sm:$0xff]  ;;  %v727_v21 = vld [vmem:[#allocation5 + $0x988] sm:$0xff] }
  0x97   :  { %632 = vmatpush.msrb.mxu1 %v140_v23  ;;  %672 = vmatpush.msrb.mxu3 %v172_v24  ;;  %v757_v23 = vld [vmem:[#allocation5 + $0xa78] sm:$0xff] }
  0x98   :  { %633 = vmatmul.f32.vlgmr.msrb.gmra.mxu1 %v1515_v26  ;;  %673 = vmatmul.f32.vlgmr.msrb.gmra.mxu3 %v1517_v32  ;;  %v706_v26 = vld [vmem:[#allocation5 + $0x8e0] sm:$0xff]  ;;  %v721_v32 = vld [vmem:[#allocation5 + $0x958] sm:$0xff] }
  0x99   :  { %826 = vmatpush.msra.mxu0 %v692_v29  ;;  %845 = vmatpush.msra.mxu1 %v709_v30  ;;  %v789_v24 = vld [vmem:[#allocation5 + $0xb78] sm:$0xff]  ;;  %v1526_v30 = vld.sshfl [vmem:[#allocation1] sm:$0xff pattern:$0x73625140] }
  0x9a   :  { %866 = vmatpush.msra.mxu2 %v724_v33  ;;  %885 = vmatpush.msra.mxu3 %v741_v34  ;;  %v1524_v29 = vld.sshfl [vmem:[#allocation1 + $0x10] sm:$0xff pattern:$0x73625140]  ;;  %v1528_v33 = vld.sshfl [vmem:[#allocation1 + $0x18] sm:$0xff pattern:$0x73625140] }
  0x9b   :  { %827 = vmatpush.msra.mxu0 %v691_v27  ;;  %846 = vmatpush.msra.mxu1 %v708_v28  ;;  %v1530_v34 = vld.sshfl [vmem:[#allocation1 + $0x8] sm:$0xff pattern:$0x73625140]  ;;  %v694_v27 = vld [vmem:[#allocation5 + $0x880] sm:$0xff] }
  0x9c   :  { %867 = vmatpush.msra.mxu2 %v723_v35  ;;  %886 = vmatpush.msra.mxu3 %v740_v31  ;;  %v726_v28 = vld [vmem:[#allocation5 + $0x980] sm:$0xff]  ;;  %1115 = vst [vmem:[#allocation1] ss:$4 sm:$0xff] %v1469_v22  ;;  %v756_v35 = vld [vmem:[#allocation5 + $0xa70] sm:$0xff]  ;;  %v773_v31 = vld [vmem:[#allocation5 + $0xaf8] sm:$0xff] }
  0x9d   :  { %828 = vmatpush.msra.mxu0 %v690_v25  ;;  %847 = vmatpush.msra.mxu1 %v707_v36  ;;  %v788_v25 = vld [vmem:[#allocation5 + $0xb70] sm:$0xff]  ;;  %v805_v36 = vld [vmem:[#allocation5 + $0xbf8] sm:$0xff]  ;;  %v771_v22 = vld [vmem:[#allocation5 + $0xae8] sm:$0xff] }
  0x9e   :  { %868 = vmatpush.msra.mxu2 %v722_v37  ;;  %887 = vmatpush.msra.mxu3 %v739_v39  ;;  %v755_v37 = vld [vmem:[#allocation5 + $0xa68] sm:$0xff]  ;;  %v772_v39 = vld [vmem:[#allocation5 + $0xaf0] sm:$0xff] }
  0x9f   :  { %829 = vmatpush.msra.mxu0 %v689_v40  ;;  %848 = vmatpush.msra.mxu1 %v706_v26  ;;  %v787_v40 = vld [vmem:[#allocation5 + $0xb68] sm:$0xff]  ;;  %v804_v26 = vld [vmem:[#allocation5 + $0xbf0] sm:$0xff] }
  0xa0   :  { %869 = vmatpush.msra.mxu2 %v721_v32  ;;  %888 = vmatpush.msra.mxu3 %v738_v41  ;;  %v754_v32 = vld [vmem:[#allocation5 + $0xa60] sm:$0xff] }
  0xa1   :  { %830 = vmatpush.msra.mxu0 %v688_v42  ;;  %849 = vmatpush.msra.mxu1 %v705_v43  ;;  %v786_v41 = vld [vmem:[#allocation5 + $0xb60] sm:$0xff]  ;;  %v803_v42 = vld [vmem:[#allocation5 + $0xbe8] sm:$0xff]  ;;  %v753_v43 = vld [vmem:[#allocation5 + $0xa58] sm:$0xff] }
  0xa2   :  { %870 = vmatpush.msra.mxu2 %v720_v44  ;;  %889 = vmatpush.msra.mxu3 %v737_v45  ;;  %v770_v44 = vld [vmem:[#allocation5 + $0xae0] sm:$0xff]  ;;  %v785_v45 = vld [vmem:[#allocation5 + $0xb58] sm:$0xff] }
  0xa3   :  { %831 = vmatpush.msra.mxu0 %v687_v46  ;;  %850 = vmatpush.msra.mxu1 %v704_v47  ;;  %v802_v46 = vld [vmem:[#allocation5 + $0xbe0] sm:$0xff]  ;;  %v752_v47 = vld [vmem:[#allocation5 + $0xa50] sm:$0xff] }
  0xa4   :  { %871 = vmatpush.msra.mxu2 %v719_v48  ;;  %890 = vmatpush.msra.mxu3 %v736_v49  ;;  %v769_v48 = vld [vmem:[#allocation5 + $0xad8] sm:$0xff] }
  0xa5   :  { %832 = vmatpush.msra.mxu0 %v686_v50  ;;  %851 = vmatpush.msra.mxu1 %v703_v51  ;;  %v1533_v49 = vld.sshfl [vmem:[#allocation1 + $0x30] sm:$0xff pattern:$0x73625140]  ;;  %v1535_v50 = vld.sshfl [vmem:[#allocation1 + $0x20] sm:$0xff pattern:$0x73625140] }
  0xa6   :  { %872 = vmatpush.msra.mxu2 %v718_v52  ;;  %891 = vmatpush.msra.mxu3 %v735_v53  ;;  %v1537_v51 = vld.sshfl [vmem:[#allocation1 + $0x38] sm:$0xff pattern:$0x73625140]  ;;  %v1539_v52 = vld.sshfl [vmem:[#allocation1 + $0x28] sm:$0xff pattern:$0x73625140] }
  0xa7   :  { %833 = vmatpush.msra.mxu0 %v685_v54  ;;  %852 = vmatpush.msra.mxu1 %v702_v55  ;;  %v784_v53 = vld [vmem:[#allocation5 + $0xb50] sm:$0xff]  ;;  %v801_v54 = vld [vmem:[#allocation5 + $0xbd8] sm:$0xff]  ;;  %1117 = vst [vmem:[#allocation1 + $0x20] ss:$4 sm:$0xff] %v1472_v38  ;;  %v751_v55 = vld [vmem:[#allocation5 + $0xa48] sm:$0xff] }
  0xa8   :  { %873 = vmatpush.msra.mxu2 %v717_v56  ;;  %892 = vmatpush.msra.mxu3 %v734_v57  ;;  %v768_v56 = vld [vmem:[#allocation5 + $0xad0] sm:$0xff]  ;;  %v783_v57 = vld [vmem:[#allocation5 + $0xb48] sm:$0xff]  ;;  %v766_v38 = vld [vmem:[#allocation5 + $0xac0] sm:$0xff] }
  0xa9   :  { %834 = vmatpush.msra.mxu0 %v684_v58  ;;  %853 = vmatpush.msra.mxu1 %v701_v59  ;;  %v800_v58 = vld [vmem:[#allocation5 + $0xbd0] sm:$0xff]  ;;  %v750_v59 = vld [vmem:[#allocation5 + $0xa40] sm:$0xff] }
  0xaa   :  { %874 = vmatpush.msra.mxu2 %v716_v60  ;;  %893 = vmatpush.msra.mxu3 %v733_v61  ;;  %v767_v60 = vld [vmem:[#allocation5 + $0xac8] sm:$0xff]  ;;  %v782_v61 = vld [vmem:[#allocation5 + $0xb40] sm:$0xff] }
  0xab   :  { %835 = vmatpush.msra.mxu0 %v683_v62  ;;  %854 = vmatpush.msra.mxu1 %v700_v63  ;;  %v799_v62 = vld [vmem:[#allocation5 + $0xbc8] sm:$0xff]  ;;  %v749_v63 = vld [vmem:[#allocation5 + $0xa38] sm:$0xff] }
  0xac   :  { %875 = vmatpush.msra.mxu2 %v715_v0  ;;  %894 = vmatpush.msra.mxu3 %v732_v1  ;;  %v781_v0 = vld [vmem:[#allocation5 + $0xb38] sm:$0xff]  ;;  %v798_v1 = vld [vmem:[#allocation5 + $0xbc0] sm:$0xff] }
  0xad   :  { %836 = vmatpush.msra.mxu0 %v682_v2  ;;  %855 = vmatpush.msra.mxu1 %v699_v3  ;;  %v748_v2 = vld [vmem:[#allocation5 + $0xa30] sm:$0xff]  ;;  %v765_v3 = vld [vmem:[#allocation5 + $0xab8] sm:$0xff] }
  0xae   :  { %876 = vmatpush.msra.mxu2 %v714_v4  ;;  %895 = vmatpush.msra.mxu3 %v731_v5  ;;  %v780_v4 = vld [vmem:[#allocation5 + $0xb30] sm:$0xff]  ;;  %v797_v5 = vld [vmem:[#allocation5 + $0xbb8] sm:$0xff] }
  0xaf   :  { %837 = vmatpush.msra.mxu0 %v681_v6  ;;  %856 = vmatpush.msra.mxu1 %v698_v7  ;;  %v747_v6 = vld [vmem:[#allocation5 + $0xa28] sm:$0xff]  ;;  %v764_v7 = vld [vmem:[#allocation5 + $0xab0] sm:$0xff] }
  0xb0   :  { %877 = vmatpush.msra.mxu2 %v713_v8  ;;  %896 = vmatpush.msra.mxu3 %v730_v9  ;;  %v779_v8 = vld [vmem:[#allocation5 + $0xb28] sm:$0xff]  ;;  %v796_v9 = vld [vmem:[#allocation5 + $0xbb0] sm:$0xff] }
  0xb1   :  { %838 = vmatpush.msra.mxu0 %v680_v10  ;;  %857 = vmatpush.msra.mxu1 %v697_v11  ;;  %v746_v10 = vld [vmem:[#allocation5 + $0xa20] sm:$0xff]  ;;  %v763_v11 = vld [vmem:[#allocation5 + $0xaa8] sm:$0xff] }
  0xb2   :  { %878 = vmatpush.msra.mxu2 %v712_v12  ;;  %897 = vmatpush.msra.mxu3 %v729_v13  ;;  %v778_v12 = vld [vmem:[#allocation5 + $0xb20] sm:$0xff]  ;;  %v795_v13 = vld [vmem:[#allocation5 + $0xba8] sm:$0xff] }
  0xb3   :  { %839 = vmatpush.msra.mxu0 %v679_v14  ;;  %858 = vmatpush.msra.mxu1 %v696_v15  ;;  %v745_v14 = vld [vmem:[#allocation5 + $0xa18] sm:$0xff]  ;;  %v762_v15 = vld [vmem:[#allocation5 + $0xaa0] sm:$0xff] }
  0xb4   :  { %879 = vmatpush.msra.mxu2 %v711_v16  ;;  %898 = vmatpush.msra.mxu3 %v728_v17  ;;  %v777_v16 = vld [vmem:[#allocation5 + $0xb18] sm:$0xff]  ;;  %v794_v17 = vld [vmem:[#allocation5 + $0xba0] sm:$0xff] }
  0xb5   :  { %840 = vmatpush.msra.mxu0 %v678_v18  ;;  %859 = vmatpush.msra.mxu1 %v695_v19  ;;  %v744_v18 = vld [vmem:[#allocation5 + $0xa10] sm:$0xff]  ;;  %v761_v19 = vld [vmem:[#allocation5 + $0xa98] sm:$0xff] }
  0xb6   :  { %880 = vmatpush.msra.mxu2 %v710_v20  ;;  %899 = vmatpush.msra.mxu3 %v727_v21  ;;  %v776_v20 = vld [vmem:[#allocation5 + $0xb10] sm:$0xff]  ;;  %v793_v21 = vld [vmem:[#allocation5 + $0xb98] sm:$0xff] }
  0xb7   :  { %905 = vmatpush.msrb.mxu0 %v757_v23  ;;  %860 = vmatpush.msra.mxu1 %v694_v27  ;;  %v743_v23 = vld [vmem:[#allocation5 + $0xa08] sm:$0xff] }
  0xb8   :  { %945 = vmatpush.msrb.mxu2 %v789_v24  ;;  %900 = vmatpush.msra.mxu3 %v726_v28  ;;  %v760_v24 = vld [vmem:[#allocation5 + $0xa90] sm:$0xff]  ;;  %v775_v27 = vld [vmem:[#allocation5 + $0xb08] sm:$0xff] }
  0xb9   :  { %906 = vmatpush.msrb.mxu0 %v756_v35  ;;  %925 = vmatpush.msrb.mxu1 %v773_v31  ;;  %v792_v28 = vld [vmem:[#allocation5 + $0xb90] sm:$0xff]  ;;  %v759_v35 = vld [vmem:[#allocation5 + $0xa88] sm:$0xff]  ;;  %v774_v31 = vld [vmem:[#allocation5 + $0xb00] sm:$0xff] }
  0xba   :  { %946 = vmatpush.msrb.mxu2 %v788_v25  ;;  %965 = vmatpush.msrb.mxu3 %v805_v36  ;;  %v791_v25 = vld [vmem:[#allocation5 + $0xb88] sm:$0xff]  ;;  %v758_v36 = vld [vmem:[#allocation5 + $0xa80] sm:$0xff] }
  0xbb   :  { %907 = vmatpush.msrb.mxu0 %v755_v37  ;;  %926 = vmatpush.msrb.mxu1 %v772_v39  ;;  %v790_v37 = vld [vmem:[#allocation5 + $0xb80] sm:$0xff]  ;;  %v1018_v39 = vld [vmem:[#allocation5 + $0xcf8] sm:$0xff] }
  0xbc   :  { %947 = vmatpush.msrb.mxu2 %v787_v40  ;;  %966 = vmatpush.msrb.mxu3 %v804_v26  ;;  %v1033_v40 = vld [vmem:[#allocation5 + $0xd70] sm:$0xff]  ;;  %v1050_v26 = vld [vmem:[#allocation5 + $0xdf8] sm:$0xff] }
  0xbd   :  { %908 = vmatpush.msrb.mxu0 %v754_v32  ;;  %927 = vmatpush.msrb.mxu1 %v771_v22  ;;  %v1000_v32 = vld [vmem:[#allocation5 + $0xc68] sm:$0xff]  ;;  %v1017_v22 = vld [vmem:[#allocation5 + $0xcf0] sm:$0xff] }
  0xbe   :  { %948 = vmatpush.msrb.mxu2 %v786_v41  ;;  %967 = vmatpush.msrb.mxu3 %v803_v42  ;;  %v1032_v41 = vld [vmem:[#allocation5 + $0xd68] sm:$0xff]  ;;  %v1049_v42 = vld [vmem:[#allocation5 + $0xdf0] sm:$0xff] }
  0xbf   :  { %909 = vmatpush.msrb.mxu0 %v753_v43  ;;  %928 = vmatpush.msrb.mxu1 %v770_v44  ;;  %v999_v43 = vld [vmem:[#allocation5 + $0xc60] sm:$0xff]  ;;  %v1016_v44 = vld [vmem:[#allocation5 + $0xce8] sm:$0xff] }
  0xc0   :  { %949 = vmatpush.msrb.mxu2 %v785_v45  ;;  %968 = vmatpush.msrb.mxu3 %v802_v46  ;;  %v1031_v45 = vld [vmem:[#allocation5 + $0xd60] sm:$0xff]  ;;  %v1048_v46 = vld [vmem:[#allocation5 + $0xde8] sm:$0xff] }
  0xc1   :  { %910 = vmatpush.msrb.mxu0 %v752_v47  ;;  %929 = vmatpush.msrb.mxu1 %v769_v48  ;;  %v998_v47 = vld [vmem:[#allocation5 + $0xc58] sm:$0xff]  ;;  %v1015_v48 = vld [vmem:[#allocation5 + $0xce0] sm:$0xff] }
  0xc2   :  { %950 = vmatpush.msrb.mxu2 %v784_v53  ;;  %969 = vmatpush.msrb.mxu3 %v801_v54  ;;  %v1014_v53 = vld [vmem:[#allocation5 + $0xcd8] sm:$0xff] }
  0xc3   :  { %911 = vmatpush.msrb.mxu0 %v751_v55  ;;  %930 = vmatpush.msrb.mxu1 %v768_v56  ;;  %v1046_v54 = vld [vmem:[#allocation5 + $0xdd8] sm:$0xff]  ;;  %v996_v55 = vld [vmem:[#allocation5 + $0xc48] sm:$0xff]  ;;  %v1013_v56 = vld [vmem:[#allocation5 + $0xcd0] sm:$0xff] }
  0xc4   :  { %951 = vmatpush.msrb.mxu2 %v783_v57  ;;  %970 = vmatpush.msrb.mxu3 %v800_v58  ;;  %v1028_v57 = vld [vmem:[#allocation5 + $0xd48] sm:$0xff]  ;;  %v1045_v58 = vld [vmem:[#allocation5 + $0xdd0] sm:$0xff] }
  0xc5   :  { %912 = vmatpush.msrb.mxu0 %v750_v59  ;;  %931 = vmatpush.msrb.mxu1 %v767_v60  ;;  %v995_v59 = vld [vmem:[#allocation5 + $0xc40] sm:$0xff]  ;;  %v1012_v60 = vld [vmem:[#allocation5 + $0xcc8] sm:$0xff] }
  0xc6   :  { %952 = vmatpush.msrb.mxu2 %v782_v61  ;;  %971 = vmatpush.msrb.mxu3 %v799_v62  ;;  %v1027_v61 = vld [vmem:[#allocation5 + $0xd40] sm:$0xff]  ;;  %v1044_v62 = vld [vmem:[#allocation5 + $0xdc8] sm:$0xff] }
  0xc7   :  { %913 = vmatpush.msrb.mxu0 %v749_v63  ;;  %932 = vmatpush.msrb.mxu1 %v766_v38  ;;  %v994_v63 = vld [vmem:[#allocation5 + $0xc38] sm:$0xff]  ;;  %v1011_v38 = vld [vmem:[#allocation5 + $0xcc0] sm:$0xff] }
  0xc8   :  { %953 = vmatpush.msrb.mxu2 %v781_v0  ;;  %972 = vmatpush.msrb.mxu3 %v798_v1  ;;  %v1026_v0 = vld [vmem:[#allocation5 + $0xd38] sm:$0xff]  ;;  %v1043_v1 = vld [vmem:[#allocation5 + $0xdc0] sm:$0xff] }
  0xc9   :  { %914 = vmatpush.msrb.mxu0 %v748_v2  ;;  %933 = vmatpush.msrb.mxu1 %v765_v3  ;;  %v993_v2 = vld [vmem:[#allocation5 + $0xc30] sm:$0xff]  ;;  %v1010_v3 = vld [vmem:[#allocation5 + $0xcb8] sm:$0xff] }
  0xca   :  { %954 = vmatpush.msrb.mxu2 %v780_v4  ;;  %973 = vmatpush.msrb.mxu3 %v797_v5  ;;  %v1025_v4 = vld [vmem:[#allocation5 + $0xd30] sm:$0xff]  ;;  %v1042_v5 = vld [vmem:[#allocation5 + $0xdb8] sm:$0xff] }
  0xcb   :  { %915 = vmatpush.msrb.mxu0 %v747_v6  ;;  %934 = vmatpush.msrb.mxu1 %v764_v7  ;;  %v992_v6 = vld [vmem:[#allocation5 + $0xc28] sm:$0xff]  ;;  %v1009_v7 = vld [vmem:[#allocation5 + $0xcb0] sm:$0xff] }
  0xcc   :  { %955 = vmatpush.msrb.mxu2 %v779_v8  ;;  %974 = vmatpush.msrb.mxu3 %v796_v9  ;;  %v1024_v8 = vld [vmem:[#allocation5 + $0xd28] sm:$0xff]  ;;  %v1041_v9 = vld [vmem:[#allocation5 + $0xdb0] sm:$0xff] }
  0xcd   :  { %916 = vmatpush.msrb.mxu0 %v746_v10  ;;  %935 = vmatpush.msrb.mxu1 %v763_v11  ;;  %v991_v10 = vld [vmem:[#allocation5 + $0xc20] sm:$0xff]  ;;  %v1008_v11 = vld [vmem:[#allocation5 + $0xca8] sm:$0xff] }
  0xce   :  { %956 = vmatpush.msrb.mxu2 %v778_v12  ;;  %975 = vmatpush.msrb.mxu3 %v795_v13  ;;  %v1023_v12 = vld [vmem:[#allocation5 + $0xd20] sm:$0xff]  ;;  %v1040_v13 = vld [vmem:[#allocation5 + $0xda8] sm:$0xff] }
  0xcf   :  { %881 = vmatmul.f32.vlgmr.msra.gmra.mxu2 %v1524_v29  ;;  %917 = vmatpush.msrb.mxu0 %v745_v14  ;;  %v742_v29 = vld [vmem:[#allocation5 + $0xa00] sm:$0xff]  ;;  %v990_v14 = vld [vmem:[#allocation5 + $0xc18] sm:$0xff] }
  0xd0   :  { %936 = vmatpush.msrb.mxu1 %v762_v15  ;;  %957 = vmatpush.msrb.mxu2 %v777_v16  ;;  %v1007_v15 = vld [vmem:[#allocation5 + $0xca0] sm:$0xff]  ;;  %v1022_v16 = vld [vmem:[#allocation5 + $0xd18] sm:$0xff] }
  0xd1   :  { %976 = vmatpush.msrb.mxu3 %v794_v17  ;;  %841 = vmatmul.f32.vlgmr.msra.gmra.mxu0 %v1526_v30  ;;  %v1002_v30 = vld [vmem:[#allocation5 + $0xc78] sm:$0xff]  ;;  %v1039_v17 = vld [vmem:[#allocation5 + $0xda0] sm:$0xff] }
  0xd2   :  { %901 = vmatmul.f32.vlgmr.msra.gmra.mxu3 %v1528_v33  ;;  %918 = vmatpush.msrb.mxu0 %v744_v18  ;;  %v1034_v33 = vld [vmem:[#allocation5 + $0xd78] sm:$0xff]  ;;  %v989_v18 = vld [vmem:[#allocation5 + $0xc10] sm:$0xff] }
  0xd3   :  { %937 = vmatpush.msrb.mxu1 %v761_v19  ;;  %958 = vmatpush.msrb.mxu2 %v776_v20  ;;  %v1006_v19 = vld [vmem:[#allocation5 + $0xc98] sm:$0xff]  ;;  %v1021_v20 = vld [vmem:[#allocation5 + $0xd10] sm:$0xff] }
  0xd4   :  { %977 = vmatpush.msrb.mxu3 %v793_v21  ;;  %861 = vmatmul.f32.vlgmr.msra.gmra.mxu1 %v1530_v34  ;;  %v1001_v34 = vld [vmem:[#allocation5 + $0xc70] sm:$0xff]  ;;  %v1038_v21 = vld [vmem:[#allocation5 + $0xd98] sm:$0xff] }
  0xd5   :  { %919 = vmatpush.msrb.mxu0 %v743_v23  ;;  %938 = vmatpush.msrb.mxu1 %v760_v24  ;;  %v988_v23 = vld [vmem:[#allocation5 + $0xc08] sm:$0xff]  ;;  %v1005_v24 = vld [vmem:[#allocation5 + $0xc90] sm:$0xff] }
  0xd6   :  { %959 = vmatpush.msrb.mxu2 %v775_v27  ;;  %978 = vmatpush.msrb.mxu3 %v792_v28  ;;  %v1020_v27 = vld [vmem:[#allocation5 + $0xd08] sm:$0xff]  ;;  %v1037_v28 = vld [vmem:[#allocation5 + $0xd90] sm:$0xff] }
  0xd7   :  { %920 = vmatpush.msrb.mxu0 %v742_v29  ;;  %939 = vmatpush.msrb.mxu1 %v759_v35  ;;  %v987_v29 = vld [vmem:[#allocation5 + $0xc00] sm:$0xff]  ;;  %v1004_v35 = vld [vmem:[#allocation5 + $0xc88] sm:$0xff] }
  0xd8   :  { %960 = vmatpush.msrb.mxu2 %v774_v31  ;;  %979 = vmatpush.msrb.mxu3 %v791_v25  ;;  %v1019_v31 = vld [vmem:[#allocation5 + $0xd00] sm:$0xff]  ;;  %v1036_v25 = vld [vmem:[#allocation5 + $0xd88] sm:$0xff] }
  0xd9   :  { %961 = vmatmul.f32.vlgmr.msrb.gmra.mxu2 %v1533_v49  ;;  %1134 = vmatpush.msra.mxu0 %v1002_v30  ;;  %v1030_v49 = vld [vmem:[#allocation5 + $0xd58] sm:$0xff] }
  0xda   :  { %1174 = vmatpush.msra.mxu2 %v1034_v33  ;;  %940 = vmatpush.msrb.mxu1 %v758_v36  ;;  %v1066_v30 = vld [vmem:[#allocation5 + $0xe78] sm:$0xff]  ;;  %v1003_v36 = vld [vmem:[#allocation5 + $0xc80] sm:$0xff] }
  0xdb   :  { %980 = vmatpush.msrb.mxu3 %v790_v37  ;;  %921 = vmatmul.f32.vlgmr.msrb.gmra.mxu0 %v1535_v50  ;;  %v1047_v50 = vld [vmem:[#allocation5 + $0xde0] sm:$0xff]  ;;  %v1098_v33 = vld [vmem:[#allocation5 + $0xf78] sm:$0xff] }
  0xdc   :  { %981 = vmatmul.f32.vlgmr.msrb.gmra.mxu3 %v1537_v51  ;;  %1135 = vmatpush.msra.mxu0 %v1001_v34  ;;  %v997_v51 = vld [vmem:[#allocation5 + $0xc50] sm:$0xff]  ;;  %v1035_v37 = vld [vmem:[#allocation5 + $0xd80] sm:$0xff] }
  0xdd   :  { %1154 = vmatpush.msra.mxu1 %v1018_v39  ;;  %1175 = vmatpush.msra.mxu2 %v1033_v40  ;;  %v1065_v34 = vld [vmem:[#allocation5 + $0xe70] sm:$0xff]  ;;  %v1082_v39 = vld [vmem:[#allocation5 + $0xef8] sm:$0xff] }
  0xde   :  { %1194 = vmatpush.msra.mxu3 %v1050_v26  ;;  %941 = vmatmul.f32.vlgmr.msrb.gmra.mxu1 %v1539_v52  ;;  %v1029_v52 = vld [vmem:[#allocation5 + $0xd50] sm:$0xff]  ;;  %v1114_v26 = vld [vmem:[#allocation5 + $0xff8] sm:$0xff] }
  0xdf   :  { %1136 = vmatpush.msra.mxu0 %v1000_v32  ;;  %1155 = vmatpush.msra.mxu1 %v1017_v22  ;;  %v1097_v40 = vld [vmem:[#allocation5 + $0xf70] sm:$0xff]  ;;  %v1064_v32 = vld [vmem:[#allocation5 + $0xe68] sm:$0xff] }
  0xe0   :  { %1176 = vmatpush.msra.mxu2 %v1032_v41  ;;  %1195 = vmatpush.msra.mxu3 %v1049_v42  ;;  %v1081_v22 = vld [vmem:[#allocation5 + $0xef0] sm:$0xff]  ;;  %v1096_v41 = vld [vmem:[#allocation5 + $0xf68] sm:$0xff] }
  0xe1   :  { %1137 = vmatpush.msra.mxu0 %v999_v43  ;;  %1156 = vmatpush.msra.mxu1 %v1016_v44  ;;  %v1113_v42 = vld [vmem:[#allocation5 + $0xff0] sm:$0xff]  ;;  %v1063_v43 = vld [vmem:[#allocation5 + $0xe60] sm:$0xff]  ;;  %v1080_v44 = vld [vmem:[#allocation5 + $0xee8] sm:$0xff] }
  0xe2   :  { %1177 = vmatpush.msra.mxu2 %v1031_v45  ;;  %1196 = vmatpush.msra.mxu3 %v1048_v46  ;;  %v1095_v45 = vld [vmem:[#allocation5 + $0xf60] sm:$0xff]  ;;  %v1112_v46 = vld [vmem:[#allocation5 + $0xfe8] sm:$0xff] }
  0xe3   :  { %1138 = vmatpush.msra.mxu0 %v998_v47  ;;  %1157 = vmatpush.msra.mxu1 %v1015_v48  ;;  %v1062_v47 = vld [vmem:[#allocation5 + $0xe58] sm:$0xff]  ;;  %v1079_v48 = vld [vmem:[#allocation5 + $0xee0] sm:$0xff] }
  0xe4   :  { %1178 = vmatpush.msra.mxu2 %v1030_v49  ;;  %1197 = vmatpush.msra.mxu3 %v1047_v50  ;;  %v1094_v49 = vld [vmem:[#allocation5 + $0xf58] sm:$0xff]  ;;  %v1111_v50 = vld [vmem:[#allocation5 + $0xfe0] sm:$0xff] }
  0xe5   :  { %1139 = vmatpush.msra.mxu0 %v997_v51  ;;  %1158 = vmatpush.msra.mxu1 %v1014_v53  ;;  %v1061_v51 = vld [vmem:[#allocation5 + $0xe50] sm:$0xff]  ;;  %v1078_v53 = vld [vmem:[#allocation5 + $0xed8] sm:$0xff] }
  0xe6   :  { %1179 = vmatpush.msra.mxu2 %v1029_v52  ;;  %1198 = vmatpush.msra.mxu3 %v1046_v54  ;;  %v1093_v52 = vld [vmem:[#allocation5 + $0xf50] sm:$0xff]  ;;  %v1110_v54 = vld [vmem:[#allocation5 + $0xfd8] sm:$0xff] }
  0xe7   :  { %1140 = vmatpush.msra.mxu0 %v996_v55  ;;  %1159 = vmatpush.msra.mxu1 %v1013_v56  ;;  %v1060_v55 = vld [vmem:[#allocation5 + $0xe48] sm:$0xff]  ;;  %v1077_v56 = vld [vmem:[#allocation5 + $0xed0] sm:$0xff] }
  0xe8   :  { %1180 = vmatpush.msra.mxu2 %v1028_v57  ;;  %1199 = vmatpush.msra.mxu3 %v1045_v58  ;;  %v1092_v57 = vld [vmem:[#allocation5 + $0xf48] sm:$0xff]  ;;  %v1109_v58 = vld [vmem:[#allocation5 + $0xfd0] sm:$0xff] }
  0xe9   :  { %1141 = vmatpush.msra.mxu0 %v995_v59  ;;  %1160 = vmatpush.msra.mxu1 %v1012_v60  ;;  %v1059_v59 = vld [vmem:[#allocation5 + $0xe40] sm:$0xff]  ;;  %v1076_v60 = vld [vmem:[#allocation5 + $0xec8] sm:$0xff] }
  0xea   :  { %1181 = vmatpush.msra.mxu2 %v1027_v61  ;;  %1200 = vmatpush.msra.mxu3 %v1044_v62  ;;  %v1091_v61 = vld [vmem:[#allocation5 + $0xf40] sm:$0xff]  ;;  %v1108_v62 = vld [vmem:[#allocation5 + $0xfc8] sm:$0xff] }
  0xeb   :  { %1142 = vmatpush.msra.mxu0 %v994_v63  ;;  %1161 = vmatpush.msra.mxu1 %v1011_v38  ;;  %v1058_v63 = vld [vmem:[#allocation5 + $0xe38] sm:$0xff]  ;;  %v1075_v38 = vld [vmem:[#allocation5 + $0xec0] sm:$0xff] }
  0xec   :  { %1182 = vmatpush.msra.mxu2 %v1026_v0  ;;  %1201 = vmatpush.msra.mxu3 %v1043_v1  ;;  %v1090_v0 = vld [vmem:[#allocation5 + $0xf38] sm:$0xff]  ;;  %v1107_v1 = vld [vmem:[#allocation5 + $0xfc0] sm:$0xff] }
  0xed   :  { %1143 = vmatpush.msra.mxu0 %v993_v2  ;;  %1162 = vmatpush.msra.mxu1 %v1010_v3  ;;  %v1057_v2 = vld [vmem:[#allocation5 + $0xe30] sm:$0xff]  ;;  %v1074_v3 = vld [vmem:[#allocation5 + $0xeb8] sm:$0xff] }
  0xee   :  { %1183 = vmatpush.msra.mxu2 %v1025_v4  ;;  %1202 = vmatpush.msra.mxu3 %v1042_v5  ;;  %v1089_v4 = vld [vmem:[#allocation5 + $0xf30] sm:$0xff]  ;;  %v1106_v5 = vld [vmem:[#allocation5 + $0xfb8] sm:$0xff] }
  0xef   :  { %1144 = vmatpush.msra.mxu0 %v992_v6  ;;  %1163 = vmatpush.msra.mxu1 %v1009_v7  ;;  %v1056_v6 = vld [vmem:[#allocation5 + $0xe28] sm:$0xff]  ;;  %v1073_v7 = vld [vmem:[#allocation5 + $0xeb0] sm:$0xff] }
  0xf0   :  { %1184 = vmatpush.msra.mxu2 %v1024_v8  ;;  %1203 = vmatpush.msra.mxu3 %v1041_v9  ;;  %v1088_v8 = vld [vmem:[#allocation5 + $0xf28] sm:$0xff]  ;;  %v1105_v9 = vld [vmem:[#allocation5 + $0xfb0] sm:$0xff] }
  0xf1   :  { %1145 = vmatpush.msra.mxu0 %v991_v10  ;;  %1164 = vmatpush.msra.mxu1 %v1008_v11  ;;  %v1120_v10 = vld.sshfl [vmem:[#allocation1 + $0x10] sm:$0xff pattern:$0x73625140]  ;;  %v1055_v11 = vld [vmem:[#allocation5 + $0xe20] sm:$0xff] }
  0xf2   :  { %1185 = vmatpush.msra.mxu2 %v1023_v12  ;;  %1204 = vmatpush.msra.mxu3 %v1040_v13  ;;  %v1072_v12 = vld [vmem:[#allocation5 + $0xea8] sm:$0xff]  ;;  %v1087_v13 = vld [vmem:[#allocation5 + $0xf20] sm:$0xff] }
  0xf3   :  { %1146 = vmatpush.msra.mxu0 %v990_v14  ;;  %1165 = vmatpush.msra.mxu1 %v1007_v15  ;;  %v1104_v14 = vld [vmem:[#allocation5 + $0xfa8] sm:$0xff] }
  0xf4   :  { %1186 = vmatpush.msra.mxu2 %v1022_v16  ;;  %1205 = vmatpush.msra.mxu3 %v1039_v17  ;;  %v1118_v15 = vld.sshfl [vmem:[#allocation1] sm:$0xff pattern:$0x73625140]  ;;  %v1121_v16 = vld.sshfl [vmem:[#allocation1 + $0x18] sm:$0xff pattern:$0x73625140] }
  0xf5   :  { %1147 = vmatpush.msra.mxu0 %v989_v18  ;;  %1166 = vmatpush.msra.mxu1 %v1006_v19  ;;  %v1054_v17 = vld [vmem:[#allocation5 + $0xe18] sm:$0xff]  ;;  %v1071_v18 = vld [vmem:[#allocation5 + $0xea0] sm:$0xff] }
  0xf6   :  { %1187 = vmatpush.msra.mxu2 %v1021_v20  ;;  %1206 = vmatpush.msra.mxu3 %v1038_v21  ;;  %v1086_v19 = vld [vmem:[#allocation5 + $0xf18] sm:$0xff]  ;;  %v1103_v20 = vld [vmem:[#allocation5 + $0xfa0] sm:$0xff]  ;;  %v1119_v21 = vld.sshfl [vmem:[#allocation1 + $0x8] sm:$0xff pattern:$0x73625140] }
  0xf7   :  { %1148 = vmatpush.msra.mxu0 %v988_v23  ;;  %1167 = vmatpush.msra.mxu1 %v1005_v24  ;;  %v1053_v23 = vld [vmem:[#allocation5 + $0xe10] sm:$0xff]  ;;  %v1070_v24 = vld [vmem:[#allocation5 + $0xe98] sm:$0xff] }
  0xf8   :  { %1188 = vmatpush.msra.mxu2 %v1020_v27  ;;  %1207 = vmatpush.msra.mxu3 %v1037_v28  ;;  %v1085_v27 = vld [vmem:[#allocation5 + $0xf10] sm:$0xff]  ;;  %v1102_v28 = vld [vmem:[#allocation5 + $0xf98] sm:$0xff] }
  0xf9   :  { %1149 = vmatpush.msra.mxu0 %v987_v29  ;;  %1168 = vmatpush.msra.mxu1 %v1004_v35  ;;  %v1052_v29 = vld [vmem:[#allocation5 + $0xe08] sm:$0xff]  ;;  %v1069_v35 = vld [vmem:[#allocation5 + $0xe90] sm:$0xff] }
  0xfa   :  { %1189 = vmatpush.msra.mxu2 %v1019_v31  ;;  %1208 = vmatpush.msra.mxu3 %v1036_v25  ;;  %v1084_v31 = vld [vmem:[#allocation5 + $0xf08] sm:$0xff]  ;;  %v1101_v25 = vld [vmem:[#allocation5 + $0xf90] sm:$0xff] }
  0xfb   :  { %1214 = vmatpush.msrb.mxu0 %v1066_v30  ;;  %1169 = vmatpush.msra.mxu1 %v1003_v36  ;;  %v1051_v30 = vld [vmem:[#allocation5 + $0xe00] sm:$0xff] }
  0xfc   :  { %1254 = vmatpush.msrb.mxu2 %v1098_v33  ;;  %1209 = vmatpush.msra.mxu3 %v1035_v37  ;;  %v1068_v33 = vld [vmem:[#allocation5 + $0xe88] sm:$0xff]  ;;  %v1083_v36 = vld [vmem:[#allocation5 + $0xf00] sm:$0xff] }
  0xfd   :  { %1215 = vmatpush.msrb.mxu0 %v1065_v34  ;;  %1234 = vmatpush.msrb.mxu1 %v1082_v39  ;;  %v1100_v37 = vld [vmem:[#allocation5 + $0xf88] sm:$0xff]  ;;  %v1124_v39 = vld.sshfl [vmem:[#allocation1 + $0x30] sm:$0xff pattern:$0x73625140] }
  0xfe   :  { %1255 = vmatpush.msrb.mxu2 %v1097_v40  ;;  %1274 = vmatpush.msrb.mxu3 %v1114_v26  ;;  %v1122_v34 = vld.sshfl [vmem:[#allocation1 + $0x20] sm:$0xff pattern:$0x73625140]  ;;  %v1067_v40 = vld [vmem:[#allocation5 + $0xe80] sm:$0xff] }
  0xff   :  { %1216 = vmatpush.msrb.mxu0 %v1064_v32  ;;  %1235 = vmatpush.msrb.mxu1 %v1081_v22  ;;  %v1099_v26 = vld [vmem:[#allocation5 + $0xf80] sm:$0xff]  ;;  %v1123_v32 = vld.sshfl [vmem:[#allocation1 + $0x28] sm:$0xff pattern:$0x73625140] }
 0x100   :  { %1256 = vmatpush.msrb.mxu2 %v1096_v41  ;;  %1275 = vmatpush.msrb.mxu3 %v1113_v42  ;;  %v1125_v22 = vld.sshfl [vmem:[#allocation1 + $0x38] sm:$0xff pattern:$0x73625140]  ;;  %v355_v41 = vpop.f32.mrf.mxu0  ;;  %v375_v42 = vpop.f32.mrf.mxu1 }
 0x101   :  { %1217 = vmatpush.msrb.mxu0 %v1063_v43  ;;  %1236 = vmatpush.msrb.mxu1 %v1080_v44  ;;  %v395_v43 = vpop.f32.mrf.mxu2  ;;  %v415_v44 = vpop.f32.mrf.mxu3 }
 0x102   :  { %1257 = vmatpush.msrb.mxu2 %v1095_v45  ;;  %1276 = vmatpush.msrb.mxu3 %v1112_v46 }
 0x103   :  { %1218 = vmatpush.msrb.mxu0 %v1062_v47  ;;  %1237 = vmatpush.msrb.mxu1 %v1079_v48 }
 0x104   :  { %1258 = vmatpush.msrb.mxu2 %v1094_v49  ;;  %1277 = vmatpush.msrb.mxu3 %v1111_v50  ;;  %v376_v50 = vadd.f32 %v375_v42, %v355_v41 }
 0x105   :  { %1219 = vmatpush.msrb.mxu0 %v1061_v51  ;;  %1238 = vmatpush.msrb.mxu1 %v1078_v53 }
 0x106   :  { %1259 = vmatpush.msrb.mxu2 %v1093_v52  ;;  %1278 = vmatpush.msrb.mxu3 %v1110_v54  ;;  %v396_v52 = vadd.f32 %v395_v43, %v376_v50 }
 0x107   :  { %1220 = vmatpush.msrb.mxu0 %v1060_v55  ;;  %1239 = vmatpush.msrb.mxu1 %v1077_v56 }
 0x108   :  { %1260 = vmatpush.msrb.mxu2 %v1092_v57  ;;  %1279 = vmatpush.msrb.mxu3 %v1109_v58  ;;  %v435_v45 = vpop.f32.mrf.mxu0  ;;  %v455_v46 = vpop.f32.mrf.mxu1  ;;  %v416_v56 = vadd.f32 %v415_v44, %v396_v52 }
 0x109   :  { %1221 = vmatpush.msrb.mxu0 %v1059_v59  ;;  %1240 = vmatpush.msrb.mxu1 %v1076_v60  ;;  %v475_v47 = vpop.f32.mrf.mxu2  ;;  %v495_v48 = vpop.f32.mrf.mxu3 }
 0x10a   :  { %1261 = vmatpush.msrb.mxu2 %v1091_v61  ;;  %1280 = vmatpush.msrb.mxu3 %v1108_v62  ;;  %v436_v59 = vadd.f32 %v435_v45, %v416_v56 }
 0x10b   :  { %1222 = vmatpush.msrb.mxu0 %v1058_v63  ;;  %1241 = vmatpush.msrb.mxu1 %v1075_v38 }
 0x10c   :  { %1262 = vmatpush.msrb.mxu2 %v1090_v0  ;;  %1281 = vmatpush.msrb.mxu3 %v1107_v1  ;;  %v456_v62 = vadd.f32 %v455_v46, %v436_v59 }
 0x10d   :  { %1223 = vmatpush.msrb.mxu0 %v1057_v2  ;;  %1242 = vmatpush.msrb.mxu1 %v1074_v3  ;;  %v1295_v3 = vld [vmem:[#allocation7] sm:$0xf] }
 0x10e   :  { %1263 = vmatpush.msrb.mxu2 %v1089_v4  ;;  %1282 = vmatpush.msrb.mxu3 %v1106_v5  ;;  %v476_v0 = vadd.f32 %v475_v47, %v456_v62 }
 0x10f   :  { %1224 = vmatpush.msrb.mxu0 %v1056_v6  ;;  %1243 = vmatpush.msrb.mxu1 %v1073_v7  ;;  %v1297_v6 = vsel %vm1296_vm0, %v1295_v3, 0.0 }
 0x110   :  { %1264 = vmatpush.msrb.mxu2 %v1088_v8  ;;  %1283 = vmatpush.msrb.mxu3 %v1105_v9  ;;  %v534_v49 = vpop.f32.mrf.mxu0  ;;  %v554_v51 = vpop.f32.mrf.mxu1  ;;  %v496_v5 = vadd.f32 %v495_v48, %v476_v0 }
 0x111   :  { %1190 = vmatmul.f32.vlgmr.msra.gmra.mxu2 %v1120_v10  ;;  %1225 = vmatpush.msrb.mxu0 %v1055_v11  ;;  %v574_v53 = vpop.f32.mrf.mxu2  ;;  %v594_v54 = vpop.f32.mrf.mxu3  ;;  %v1298_v11 = vrot.slane %v1297_v6, 4 }
 0x112   :  { %1244 = vmatpush.msrb.mxu1 %v1072_v12  ;;  %1265 = vmatpush.msrb.mxu2 %v1087_v13  ;;  %v535_v7 = vadd.f32 %v534_v49, %v496_v5 }
 0x113   :  { %1284 = vmatpush.msrb.mxu3 %v1104_v14  ;;  %1150 = vmatmul.f32.vlgmr.msra.gmra.mxu0 %v1118_v15 }
 0x114   :  { %1210 = vmatmul.f32.vlgmr.msra.gmra.mxu3 %v1121_v16  ;;  %1226 = vmatpush.msrb.mxu0 %v1054_v17  ;;  %v555_v12 = vadd.f32 %v554_v51, %v535_v7  ;;  %v1299_v17 = vadd.f32 %v1298_v11, %v1297_v6 }
 0x115   :  { %1245 = vmatpush.msrb.mxu1 %v1071_v18  ;;  %1266 = vmatpush.msrb.mxu2 %v1086_v19 }
 0x116   :  { %1285 = vmatpush.msrb.mxu3 %v1103_v20  ;;  %1170 = vmatmul.f32.vlgmr.msra.gmra.mxu1 %v1119_v21  ;;  %v575_v16 = vadd.f32 %v574_v53, %v555_v12 }
 0x117   :  { %1227 = vmatpush.msrb.mxu0 %v1053_v23  ;;  %1246 = vmatpush.msrb.mxu1 %v1070_v24  ;;  %v1300_v24 = vrot.slane %v1299_v17, 2 }
 0x118   :  { %1267 = vmatpush.msrb.mxu2 %v1085_v27  ;;  %1286 = vmatpush.msrb.mxu3 %v1102_v28  ;;  %v614_v55 = vpop.f32.mrf.mxu0  ;;  %v634_v57 = vpop.f32.mrf.mxu1  ;;  %v595_v23 = vadd.f32 %v594_v54, %v575_v16 }
 0x119   :  { %1228 = vmatpush.msrb.mxu0 %v1052_v29  ;;  %1247 = vmatpush.msrb.mxu1 %v1069_v35  ;;  %v654_v58 = vpop.f32.mrf.mxu2 }
 0x11a   :  { %1268 = vmatpush.msrb.mxu2 %v1084_v31  ;;  %1287 = vmatpush.msrb.mxu3 %v1101_v25  ;;  %v615_v28 = vadd.f32 %v614_v55, %v595_v23  ;;  %v1301_v25 = vadd.f32 %v1300_v24, %v1299_v17 }
 0x11b   :  { %1229 = vmatpush.msrb.mxu0 %v1051_v30  ;;  %1248 = vmatpush.msrb.mxu1 %v1068_v33  ;;  %v674_v60 = vpop.f32.mrf.mxu3 }
 0x11c   :  { %1269 = vmatpush.msrb.mxu2 %v1083_v36  ;;  %1288 = vmatpush.msrb.mxu3 %v1100_v37  ;;  %v635_v33 = vadd.f32 %v634_v57, %v615_v28 }
 0x11d   :  { %1230 = vmatmul.f32.vlgmr.msrb.gmra.mxu0 %v1122_v34  ;;  %1270 = vmatmul.f32.vlgmr.msrb.gmra.mxu2 %v1124_v39 }
 0x11e   :  { %1249 = vmatpush.msrb.mxu1 %v1067_v40  ;;  %1289 = vmatpush.msrb.mxu3 %v1099_v26  ;;  %v655_v39 = vadd.f32 %v654_v58, %v635_v33  ;;  %v1302_v40 = vrot.slane %v1301_v25, 1 }
 0x11f   :  { %1250 = vmatmul.f32.vlgmr.msrb.gmra.mxu1 %v1123_v32  ;;  %1290 = vmatmul.f32.vlgmr.msrb.gmra.mxu3 %v1125_v22 }
 0x120   :  { %v675_v41 = vadd.f32 %v674_v60, %v655_v39  ;;  %v1303_v43 = vadd.f32 %v1302_v40, %v1301_v25 }
 0x122   :  { %v1304_v48 = vmul.f32 0.25, %v1303_v43 }
 0x14e   :  { %v842_v61 = vpop.f32.mrf.mxu0 }
 0x151   :  { %v862_v63 = vpop.f32.mrf.mxu1 }
 0x152   :  { %v882_v38 = vpop.f32.mrf.mxu2  ;;  %v863_v2 = vadd.f32 %v862_v63, %v842_v61 }
 0x154   :  { %v883_v8 = vadd.f32 %v882_v38, %v863_v2 }
 0x155   :  { %v902_v1 = vpop.f32.mrf.mxu3 }
 0x156   :  { %v903_v13 = vadd.f32 %v902_v1, %v883_v8 }
 0x158   :  { %v922_v4 = vpop.f32.mrf.mxu0 }
 0x159   :  { %v923_v18 = vadd.f32 %v922_v4, %v903_v13 }
 0x15b   :  { %v942_v9 = vpop.f32.mrf.mxu1 }
 0x15c   :  { %v962_v10 = vpop.f32.mrf.mxu2  ;;  %v943_v29 = vadd.f32 %v942_v9, %v923_v18 }
 0x15e   :  { %v963_v36 = vadd.f32 %v962_v10, %v943_v29 }
 0x15f   :  { %v982_v14 = vpop.f32.mrf.mxu3 }
 0x160   :  { %v983_v26 = vadd.f32 %v982_v14, %v963_v36 }
 0x162   :  { %v985_v45 = vadd.f32 %v983_v26, %v675_v41 }
 0x190   :  { %v1151_v15 = vpop.f32.mrf.mxu0 }
 0x193   :  { %v1171_v19 = vpop.f32.mrf.mxu1 }
 0x194   :  { %v1172_v20 = vadd.f32 %v1171_v19, %v1151_v15  ;;  %v1191_v21 = vpop.f32.mrf.mxu2 }
 0x196   :  { %v1192_v27 = vadd.f32 %v1191_v21, %v1172_v20 }
 0x197   :  { %v1211_v35 = vpop.f32.mrf.mxu3 }
 0x198   :  { %v1212_v31 = vadd.f32 %v1211_v35, %v1192_v27 }
 0x19a   :  { %v1231_v30 = vpop.f32.mrf.mxu0 }
 0x19b   :  { %v1232_v37 = vadd.f32 %v1231_v30, %v1212_v31 }
 0x19c   :  { %v1251_v34 = vpop.f32.mrf.mxu1 }
 0x19d   :  { %v1252_v32 = vadd.f32 %v1251_v34, %v1232_v37 }
 0x1a0   :  { %v1271_v22 = vpop.f32.mrf.mxu2 }
 0x1a1   :  { %v1272_v42 = vadd.f32 %v1271_v22, %v1252_v32 }
 0x1a2   :  { %v1291_v44 = vpop.f32.mrf.mxu3 }
 0x1a3   :  { %v1292_v46 = vadd.f32 %v1291_v44, %v1272_v42 }
 0x1a5   :  { %v1294_v47 = vadd.f32 %v1292_v46, %v985_v45 }
 0x1a7   :  { %v1305_v49 = vmul.f32 0.25, %v1294_v47 }
 0x1a9   :  { %v1306_v50 = vadd.f32 %v1305_v49, %v1304_v48 }
 0x1ab   :  { %1307 = vst [vmem:[#allocation8] sm:$0x3] %v1306_v50 }
 0x1ac   :  { %1318 = dma.vmem_to_hbm [thread:$0]  %s1314_s2, 32, %s1316_s30, [#allocation4]  }
 0x1ad   :  { %1432 = dma.done.wait [#allocation4], 32  }
 0x1ae   :  { %1433 = vsyncadd [#allocation4], 4294967264 }
 0x1af   :  { %1323 = vsyncpa [#allocation3], 1 }
 0x1b0   :  { %1324 = vsyncpa [#allocation6], 1 }
 0x1b1   :  { %1325 = vsyncpa [#allocation4], 1 }

</bundles_post_ra>
